<compile_context>
chip_gen: v5e
topology: v5e:2x2
jax: 0.10.0
libtpu: 0.0.40
codegen_flags: <defaults>
</compile_context>

<pallas_src>
import jax
import jax.numpy as jnp
from jax.experimental import pallas as pl
from jax.experimental.pallas import tpu as pltpu


def _round_up(x, m):
    return ((x + m - 1) // m) * m


def _offset_branch_kernel(x_ref, w1_ref, b1_ref, w2_ref, b2_ref, w3_ref, b3_ref, o_ref):
    # x block: (1, C_in, TN) f32 straight from the native (B, C_in, N) layout.
    # Cast to bf16 here (hidden under the MXU) instead of an extra XLA pass over HBM.
    x = x_ref[0].astype(jnp.bfloat16)                                 # (C_in, TN)

    # SharedMLP layer 1: 1x1 conv (BN folded) + LeakyReLU(0.2); bf16 MXU, f32 accumulate.
    h = jnp.dot(w1_ref[...], x, preferred_element_type=jnp.float32) + b1_ref[...]
    h = jnp.maximum(h, 0.2 * h)                                       # f32 VPU (v5e-safe)
    h = h.astype(jnp.bfloat16)

    # SharedMLP layer 2: 1x1 conv (BN folded) + LeakyReLU(0.2).
    h = jnp.dot(w2_ref[...], h, preferred_element_type=jnp.float32) + b2_ref[...]
    h = jnp.maximum(h, 0.2 * h)                                       # stays f32: feeds VPU head

    # TODO(synk): Dropout1d is identity in eval mode; train-mode channel dropout would
    # need pltpu.prng_random_bits + a per-channel mask.

    # Final Conv1d(128, 3, k=1) with bias, on the VPU (keeps the MXU for the fat layers):
    # o[j, n] = sum_c h[c, n] * w3[c, j] + b3[j].  w3 is (C2, 3) f32, so w3[:, j:j+1] is a
    # (C2, 1) lane-broadcast; the channel reduction is sublane-axis adds.
    w3 = w3_ref[...]                                                  # (C2, 3) f32
    cols = [
        jnp.sum(h * w3[:, j:j + 1], axis=0, keepdims=True)            # (1, TN)
        for j in range(w3_ref.shape[1])
    ]
    o = jnp.concatenate(cols, axis=0) + b3_ref[...]                   # (3, TN) f32
    o_ref[0] = o.astype(o_ref.dtype)


def offset_branch_forward(x_ncl, params, *, tile_n=2048):
    """x_ncl: (B, C_in, N) float32  ->  (B, 3, N) float32 (matches PyTorch NCL layout)."""
    w1, b1, w2, b2, w3, b3 = params
    B, C_in, N = x_ncl.shape
    C1, C2 = w1.shape[0], w2.shape[0]
    C_out = w3.shape[1]

    # Cap the lane tile: never bigger than the 128-rounded point count, and when B == 1
    # keep at least two grid steps so both v7x TensorCores get work.
    tile_n = max(128, min(tile_n, _round_up(N, 128)))
    if B == 1:
        tile_n = max(128, min(tile_n, _round_up(pl.cdiv(N, 2), 128)))
    n_tiles = pl.cdiv(N, tile_n)

    return pl.pallas_call(
        _offset_branch_kernel,
        out_shape=jax.ShapeDtypeStruct((B, C_out, N), jnp.float32),
        grid_spec=pltpu.PrefetchScalarGridSpec(
            num_scalar_prefetch=0,
            grid=(B, n_tiles),
            in_specs=[
                pl.BlockSpec((1, C_in, tile_n), lambda b, n: (b, 0, n)),
                pl.BlockSpec((C1, C_in), lambda b, n: (0, 0)),
                pl.BlockSpec((C1, 1), lambda b, n: (0, 0)),
                pl.BlockSpec((C2, C1), lambda b, n: (0, 0)),
                pl.BlockSpec((C2, 1), lambda b, n: (0, 0)),
                pl.BlockSpec((C2, C_out), lambda b, n: (0, 0)),
                pl.BlockSpec((C_out, 1), lambda b, n: (0, 0)),
            ],
            out_specs=pl.BlockSpec((1, C_out, tile_n), lambda b, n: (b, 0, n)),
        ),
        compiler_params=pltpu.CompilerParams(
            dimension_semantics=("parallel", "parallel"),
            vmem_limit_bytes=32 * 1024 * 1024),
    )(x_ncl, w1, b1, w2, b2, w3, b3)


def make_params(key, c_in):
    """Deterministic synthetic params; BatchNorm folded into the conv weights.

    MXU weights are channel-major (C_out, C_in) bf16; the tiny head weight is (C2, 3) f32
    (it never touches the MXU); biases are (C, 1) f32.
    """
    ks = jax.random.split(key, 12)
    eps = 1e-5

    def folded_conv_bn(kw, kg, kb, km, kv, cin, cout):
        w = jax.random.normal(kw, (cout, cin), jnp.float32) * 0.05
        gamma = 1.0 + 0.1 * jax.random.normal(kg, (cout,), jnp.float32)
        beta = 0.1 * jax.random.normal(kb, (cout,), jnp.float32)
        mean = 0.1 * jax.random.normal(km, (cout,), jnp.float32)
        var = jnp.abs(jax.random.normal(kv, (cout,), jnp.float32)) + 0.5
        scale = gamma / jnp.sqrt(var + eps)
        w_f = (w * scale[:, None]).astype(jnp.bfloat16)               # (cout, cin) bf16
        b_f = (beta - mean * scale)[:, None]                          # (cout, 1) f32
        return w_f, b_f

    w1, b1 = folded_conv_bn(ks[0], ks[1], ks[2], ks[3], ks[4], c_in, 256)
    w2, b2 = folded_conv_bn(ks[5], ks[6], ks[7], ks[8], ks[9], 256, 128)
    w3 = jax.random.normal(ks[10], (128, 3), jnp.float32) * 0.05       # (C2, 3) f32
    b3 = 0.1 * jax.random.normal(ks[11], (3, 1), jnp.float32)
    return (w1, b1, w2, b2, w3, b3)


def reference_forward(x_ncl, params):
    """Pure-JAX reference mirroring the kernel's dtype choices."""
    w1, b1, w2, b2, w3, b3 = params
    h = x_ncl.astype(jnp.bfloat16).astype(jnp.float32)                # (B, C_in, N)
    h = jnp.einsum('oc,bcn->bon', w1.astype(jnp.float32), h) + b1[None]
    h = jnp.maximum(h, 0.2 * h)
    h = h.astype(jnp.bfloat16).astype(jnp.float32)
    h = jnp.einsum('oc,bcn->bon', w2.astype(jnp.float32), h) + b2[None]
    h = jnp.maximum(h, 0.2 * h)
    return jnp.einsum('co,bcn->bon', w3, h) + b3[None]                # (B, 3, N)


if __name__ == "__main__":
    # args.emb_dims=32, args.n_edgeconvs_backbone=1 -> C_in = 32 + 1*64 = 96
    # N deliberately not a multiple of 128 to exercise the partial-block path.
    B, C_in, N = 2, 96, 200
    key = jax.random.PRNGKey(0)
    kx, kp = jax.random.split(key)
    x = jax.random.normal(kx, (B, C_in, N), jnp.float32)
    params = make_params(kp, C_in)

    out = jax.block_until_ready(offset_branch_forward(x, params))
    ref = reference_forward(x, params)
    assert out.shape == (B, 3, N)
    assert jnp.allclose(out, ref, atol=2e-3, rtol=2e-3)
    print("KERNEL_OK")
</pallas_src>

<mosaic_0001>
module attributes {stable_mosaic.version = 11 : i64} {
  func.func @_offset_branch_kernel(%arg0: i32, %arg1: i32, %arg2: memref<1x96x256xf32, #tpu.memory_space<vmem>>, %arg3: memref<256x96xbf16, #tpu.memory_space<vmem>>, %arg4: memref<256x1xf32, #tpu.memory_space<vmem>>, %arg5: memref<128x256xbf16, #tpu.memory_space<vmem>>, %arg6: memref<128x1xf32, #tpu.memory_space<vmem>>, %arg7: memref<128x3xf32, #tpu.memory_space<vmem>>, %arg8: memref<3x1xf32, #tpu.memory_space<vmem>>, %arg9: memref<1x3x256xf32, #tpu.memory_space<vmem>>) attributes {dimension_semantics = [#tpu.dimension_semantics<parallel>, #tpu.dimension_semantics<parallel>], iteration_bounds = array<i64: 2, 1>, scalar_prefetch = 0 : i64, scratch_operands = 0 : i64, tpu.core_type = #tpu.core_type<tc>, window_params = [{transform_indices = @transform_0, window_bounds = array<i64: 1, 96, 256>}, {pipeline_mode = #tpu.pipeline_mode<synchronous>, transform_indices = @transform_1, window_bounds = array<i64: 256, 96>}, {pipeline_mode = #tpu.pipeline_mode<synchronous>, transform_indices = @transform_2, window_bounds = array<i64: 256, 1>}, {pipeline_mode = #tpu.pipeline_mode<synchronous>, transform_indices = @transform_3, window_bounds = array<i64: 128, 256>}, {pipeline_mode = #tpu.pipeline_mode<synchronous>, transform_indices = @transform_4, window_bounds = array<i64: 128, 1>}, {pipeline_mode = #tpu.pipeline_mode<synchronous>, transform_indices = @transform_5, window_bounds = array<i64: 128, 3>}, {pipeline_mode = #tpu.pipeline_mode<synchronous>, transform_indices = @transform_6, window_bounds = array<i64: 3, 1>}, {transform_indices = @transform_7, window_bounds = array<i64: 1, 3, 256>}]} {
    %c0 = arith.constant 0 : index
    %c0_0 = arith.constant 0 : index
    %c0_1 = arith.constant 0 : index
    %0 = vector.load %arg2[%c0, %c0_0, %c0_1] : memref<1x96x256xf32, #tpu.memory_space<vmem>>, vector<1x96x256xf32>
    %1 = vector.shape_cast %0 : vector<1x96x256xf32> to vector<96x256xf32>
    %2 = arith.truncf %1 : vector<96x256xf32> to vector<96x256xbf16>
    %c0_2 = arith.constant 0 : index
    %c0_3 = arith.constant 0 : index
    %3 = vector.load %arg3[%c0_2, %c0_3] : memref<256x96xbf16, #tpu.memory_space<vmem>>, vector<256x96xbf16>
    %cst = arith.constant dense<0.000000e+00> : vector<256x256xf32>
    %4 = tpu.matmul %3, %2, %cst {dimension_numbers = #tpu.dot_dimension_numbers<[1], [0], [0], [1], [0, 0, 1, 1], [], []>} : vector<256x96xbf16>, vector<96x256xbf16>, vector<256x256xf32> -> vector<256x256xf32>
    %c0_4 = arith.constant 0 : index
    %c0_5 = arith.constant 0 : index
    %5 = vector.load %arg4[%c0_4, %c0_5] : memref<256x1xf32, #tpu.memory_space<vmem>>, vector<256x1xf32>
    %6 = vector.broadcast %5 : vector<256x1xf32> to vector<256x256xf32>
    %7 = arith.addf %4, %6 : vector<256x256xf32>
    %cst_6 = arith.constant 2.000000e-01 : f32
    %8 = vector.broadcast %cst_6 : f32 to vector<256x256xf32>
    %9 = arith.mulf %8, %7 : vector<256x256xf32>
    %10 = arith.maximumf %7, %9 : vector<256x256xf32>
    %11 = arith.truncf %10 : vector<256x256xf32> to vector<256x256xbf16>
    %c0_7 = arith.constant 0 : index
    %c0_8 = arith.constant 0 : index
    %12 = vector.load %arg5[%c0_7, %c0_8] : memref<128x256xbf16, #tpu.memory_space<vmem>>, vector<128x256xbf16>
    %cst_9 = arith.constant dense<0.000000e+00> : vector<128x256xf32>
    %13 = tpu.matmul %12, %11, %cst_9 {dimension_numbers = #tpu.dot_dimension_numbers<[1], [0], [0], [1], [0, 0, 1, 1], [], []>} : vector<128x256xbf16>, vector<256x256xbf16>, vector<128x256xf32> -> vector<128x256xf32>
    %c0_10 = arith.constant 0 : index
    %c0_11 = arith.constant 0 : index
    %14 = vector.load %arg6[%c0_10, %c0_11] : memref<128x1xf32, #tpu.memory_space<vmem>>, vector<128x1xf32>
    %15 = vector.broadcast %14 : vector<128x1xf32> to vector<128x256xf32>
    %16 = arith.addf %13, %15 : vector<128x256xf32>
    %cst_12 = arith.constant 2.000000e-01 : f32
    %17 = vector.broadcast %cst_12 : f32 to vector<128x256xf32>
    %18 = arith.mulf %17, %16 : vector<128x256xf32>
    %19 = arith.maximumf %16, %18 : vector<128x256xf32>
    %c0_13 = arith.constant 0 : index
    %c0_14 = arith.constant 0 : index
    %20 = vector.load %arg7[%c0_13, %c0_14] : memref<128x3xf32, #tpu.memory_space<vmem>>, vector<128x3xf32>
    %21 = vector.extract_strided_slice %20 {offsets = [0, 0], sizes = [128, 1], strides = [1, 1]} : vector<128x3xf32> to vector<128x1xf32>
    %22 = vector.broadcast %21 : vector<128x1xf32> to vector<128x256xf32>
    %23 = arith.mulf %19, %22 : vector<128x256xf32>
    %cst_15 = arith.constant dense<0.000000e+00> : vector<256xf32>
    %24 = vector.multi_reduction <add>, %23, %cst_15 [0] : vector<128x256xf32> to vector<256xf32>
    %25 = vector.shape_cast %24 : vector<256xf32> to vector<1x256xf32>
    %26 = vector.extract_strided_slice %20 {offsets = [0, 1], sizes = [128, 1], strides = [1, 1]} : vector<128x3xf32> to vector<128x1xf32>
    %27 = vector.broadcast %26 : vector<128x1xf32> to vector<128x256xf32>
    %28 = arith.mulf %19, %27 : vector<128x256xf32>
    %cst_16 = arith.constant dense<0.000000e+00> : vector<256xf32>
    %29 = vector.multi_reduction <add>, %28, %cst_16 [0] : vector<128x256xf32> to vector<256xf32>
    %30 = vector.shape_cast %29 : vector<256xf32> to vector<1x256xf32>
    %31 = vector.extract_strided_slice %20 {offsets = [0, 2], sizes = [128, 1], strides = [1, 1]} : vector<128x3xf32> to vector<128x1xf32>
    %32 = vector.broadcast %31 : vector<128x1xf32> to vector<128x256xf32>
    %33 = arith.mulf %19, %32 : vector<128x256xf32>
    %cst_17 = arith.constant dense<0.000000e+00> : vector<256xf32>
    %34 = vector.multi_reduction <add>, %33, %cst_17 [0] : vector<128x256xf32> to vector<256xf32>
    %35 = vector.shape_cast %34 : vector<256xf32> to vector<1x256xf32>
    %36 = tpu.concatenate %25, %30, %35 in 0 : vector<1x256xf32>, vector<1x256xf32>, vector<1x256xf32> -> vector<3x256xf32>
    %c0_18 = arith.constant 0 : index
    %c0_19 = arith.constant 0 : index
    %37 = vector.load %arg8[%c0_18, %c0_19] : memref<3x1xf32, #tpu.memory_space<vmem>>, vector<3x1xf32>
    %38 = vector.broadcast %37 : vector<3x1xf32> to vector<3x256xf32>
    %39 = arith.addf %36, %38 : vector<3x256xf32>
    %c0_20 = arith.constant 0 : index
    %c0_21 = arith.constant 0 : index
    %c0_22 = arith.constant 0 : index
    %40 = vector.load %arg9[%c0_20, %c0_21, %c0_22] : memref<1x3x256xf32, #tpu.memory_space<vmem>>, vector<1x3x256xf32>
    %41 = vector.shape_cast %40 : vector<1x3x256xf32> to vector<3x256xf32>
    %42 = vector.shape_cast %39 : vector<3x256xf32> to vector<1x3x256xf32>
    tpu.vector_store %arg9[%c0_20, %c0_21, %c0_22], %42 {strides = array<i32>} : memref<1x3x256xf32, #tpu.memory_space<vmem>>, vector<1x3x256xf32>,
    return
  }
  func.func @transform_0(%arg0: i32, %arg1: i32) -> (i32, i32, i32) {
    %c0_i32 = arith.constant 0 : i32
    %c0_i32_0 = arith.constant 0 : i32
    return %arg0, %c0_i32, %arg1 : i32, i32, i32
  }
  func.func @transform_1(%arg0: i32, %arg1: i32) -> (i32, i32) {
    %c0_i32 = arith.constant 0 : i32
    %c0_i32_0 = arith.constant 0 : i32
    %c0_i32_1 = arith.constant 0 : i32
    return %c0_i32, %c0_i32_0 : i32, i32
  }
  func.func @transform_2(%arg0: i32, %arg1: i32) -> (i32, i32) {
    %c0_i32 = arith.constant 0 : i32
    %c0_i32_0 = arith.constant 0 : i32
    %c0_i32_1 = arith.constant 0 : i32
    return %c0_i32, %c0_i32_0 : i32, i32
  }
  func.func @transform_3(%arg0: i32, %arg1: i32) -> (i32, i32) {
    %c0_i32 = arith.constant 0 : i32
    %c0_i32_0 = arith.constant 0 : i32
    %c0_i32_1 = arith.constant 0 : i32
    return %c0_i32, %c0_i32_0 : i32, i32
  }
  func.func @transform_4(%arg0: i32, %arg1: i32) -> (i32, i32) {
    %c0_i32 = arith.constant 0 : i32
    %c0_i32_0 = arith.constant 0 : i32
    %c0_i32_1 = arith.constant 0 : i32
    return %c0_i32, %c0_i32_0 : i32, i32
  }
  func.func @transform_5(%arg0: i32, %arg1: i32) -> (i32, i32) {
    %c0_i32 = arith.constant 0 : i32
    %c0_i32_0 = arith.constant 0 : i32
    %c0_i32_1 = arith.constant 0 : i32
    return %c0_i32, %c0_i32_0 : i32, i32
  }
  func.func @transform_6(%arg0: i32, %arg1: i32) -> (i32, i32) {
    %c0_i32 = arith.constant 0 : i32
    %c0_i32_0 = arith.constant 0 : i32
    %c0_i32_1 = arith.constant 0 : i32
    return %c0_i32, %c0_i32_0 : i32, i32
  }
  func.func @transform_7(%arg0: i32, %arg1: i32) -> (i32, i32, i32) {
    %c0_i32 = arith.constant 0 : i32
    %c0_i32_0 = arith.constant 0 : i32
    return %arg0, %c0_i32, %arg1 : i32, i32, i32
  }
}

</mosaic_0001>

<bundles_post_ra>
// kernel: tpu_custom_call.1
= control target key start
LH: loop header
LB: loop body
LE: loop exit
PB: predicated region body
PF: predicated region fallthrough
CT: control target
= control target key end

     0   :  { %s2361_s24 = smov 0   ;;  %s2363_s25 = smov 0   ;;  %s3453_s0 = inlined_call_operand.vmem [shape: f32[2,96,200], index: 0, kind: input, shape index: {}]   ;;  %s3454_s1 = inlined_call_operand.vmem [shape: bf16[256,96], index: 1, kind: input, shape index: {}]   ;;  %s3455_s2 = inlined_call_operand.vmem [shape: f32[256,1], index: 2, kind: input, shape index: {}]   ;;  %s3456_s3 = inlined_call_operand.vmem [shape: bf16[128,256], index: 3, kind: input, shape index: {}]   ;;  %s3457_s4 = inlined_call_operand.vmem [shape: f32[128,1], index: 4, kind: input, shape index: {}]   ;;  %s3458_s5 = inlined_call_operand.vmem [shape: f32[128,3], index: 5, kind: input, shape index: {}]   ;;  %s3459_s6 = inlined_call_operand.vmem [shape: f32[3,1], index: 6, kind: input, shape index: {}]   ;;  %s3460_s7 = inlined_call_operand.vmem [shape: f32[2,3,200], index: 7, kind: output, shape index: {}]  }
   0x1   :  { %s2365_s26 = smov 0  }
   0x2 LB: > { %s29_s27 = sadd.s32 1, %s2312_s25  ;;  %p2056_p0 = scmp.ge.s32.totalorder %s2316_s26, 1  ;;  %s2316_s26 = sphi %s2365_s26, %s17_s26   ;;  %s2312_s25 = sphi %s2363_s25, %s3637_s25   ;;  %s2308_s24 = sphi %s2361_s24, %s3636_s24  }
   0x3   : > { %p31_p1 = scmp.ge.s32.totalorder %s29_s27, 2  ;;  %p258_p2 = scmp.lt.s32.totalorder %s2316_s26, 3 }
   0x5   : > { %s3639_s27 = smov (%p31_p1, %s29_s27), 0  ;;  %p259_p3 = pnand %p2056_p0, %p258_p2 }
   0x7   : > { %262 = sbr.rel (%p259_p3) target bundleno = 867 (0x363), region = 48 }
   0xc   : > { %p299_p4 = scmp.lt.s32.totalorder %s2308_s24, 1  ;;  %v387_v0 = vld [vmem:[%s3455_s2] sm:$0xff]  ;;  %v3461_v1 = vmov 0   ;;  %v388_v25 = vld [vmem:[%s3455_s2 + $0x8] sm:$0xff]  ;;  %v389_v26 = vld [vmem:[%s3455_s2 + $0x10] sm:$0xff]  ;;  %vm659_vm0 = vcmask 785408  }
   0xd   : > { %2283 = vset.pattern.permute.xlu0 %v3461_v1  ;;  %2284 = vset.pattern.permute.xlu1 %v3461_v1  ;;  %v2223_v40 = vld [vmem:[%s3454_s1] sm:$0xff]  ;;  %v390_v41 = vld [vmem:[%s3455_s2 + $0x18] sm:$0xff]  ;;  %v2224_v42 = vld [vmem:[%s3454_s1 + $0x8] sm:$0xff]  ;;  %vm1944_vm1 = vcmask 1040384   ;;  %vm1947_vm2 = vcmask 1041408   ;;  %vm1961_vm3 = vcmask 1043456  }
   0xe   : > { %s3641_s24 = smov (!%p299_p4, %s2308_s24), 1  ;;  %421 = vperm.xlu0 %2283, %v387_v0   ;;  %2285 = vset.pattern.permute.xlu2 %v3461_v1  ;;  %v393_v43 = vld [vmem:[%s3455_s2 + $0x30] sm:$0xff]  ;;  %v394_v44 = vld [vmem:[%s3455_s2 + $0x38] sm:$0xff]  ;;  %v396_v45 = vld [vmem:[%s3455_s2 + $0x48] sm:$0xff] }
   0xf   : > { %s2255_s30 = smul.u32 192, %s3641_s24  ;;  %431 = vperm.xlu1 %2284, %v389_v26   ;;  %v2225_v46 = vld [vmem:[%s3454_s1 + $0x10] sm:$0xff]  ;;  %v391_v47 = vld [vmem:[%s3455_s2 + $0x20] sm:$0xff]  ;;  %v392_v50 = vld [vmem:[%s3455_s2 + $0x28] sm:$0xff] }
  0x10   : > { %v397_v48 = vld [vmem:[%s3455_s2 + $0x50] sm:$0xff]  ;;  %v399_v49 = vld [vmem:[%s3455_s2 + $0x60] sm:$0xff]  ;;  %441 = vperm.xlu2 %2285, %v391_v47   ;;  %v400_v51 = vld [vmem:[%s3455_s2 + $0x68] sm:$0xff] }
  0x11   : > { %s2391_s10 = scalar_lea.vmem %s3453_s0, %s2255_s30  ;;  %v402_v52 = vld [vmem:[%s3455_s2 + $0x78] sm:$0xff]  ;;  %v417_v54 = vld [vmem:[%s3455_s2 + $0xf0] sm:$0xff]  ;;  %v415_v55 = vld [vmem:[%s3455_s2 + $0xe0] sm:$0xff]  ;;  %s2222_s30 = sshll.u32 %s3641_s24, 3 }
  0x12   : > { %v339_v2 = vld [vmem:[%s2391_s10 + $0xa0] sm:$0xff]  ;;  %v341_v3 = vld [vmem:[%s2391_s10 + $0xb0] sm:$0xff]  ;;  %v340_v4 = vld [vmem:[%s2391_s10 + $0xa8] sm:$0xff] }
  0x13   : > { %v353_v5 = vpack.c.bf16 %v341_v3, %v339_v2  ;;  %v342_v6 = vld [vmem:[%s2391_s10 + $0xb8] sm:$0xff]  ;;  %v335_v7 = vld [vmem:[%s2391_s10 + $0x80] sm:$0xff]  ;;  %v337_v8 = vld [vmem:[%s2391_s10 + $0x90] sm:$0xff] }
  0x14   : > { %v354_v9 = vpack.c.bf16 %v342_v6, %v340_v4  ;;  %v336_v10 = vld [vmem:[%s2391_s10 + $0x88] sm:$0xff]  ;;  %v338_v11 = vld [vmem:[%s2391_s10 + $0x98] sm:$0xff]  ;;  %v351_v12 = vpack.c.bf16 %v337_v8, %v335_v7  ;;  %v331_v14 = vld [vmem:[%s2391_s10 + $0x60] sm:$0xff] }
  0x15   : > { %710 = vmatpush.bf16.msra.mxu0 %v353_v5  ;;  %v352_v13 = vpack.c.bf16 %v338_v11, %v336_v10  ;;  %v333_v15 = vld [vmem:[%s2391_s10 + $0x70] sm:$0xff]  ;;  %v332_v16 = vld [vmem:[%s2391_s10 + $0x68] sm:$0xff]  ;;  %v334_v17 = vld [vmem:[%s2391_s10 + $0x78] sm:$0xff] }
  0x16   : > { %799 = vmatpush.bf16.msra.mxu1 %v354_v9  ;;  %v349_v18 = vpack.c.bf16 %v333_v15, %v331_v14  ;;  %v350_v19 = vpack.c.bf16 %v334_v17, %v332_v16  ;;  %v327_v20 = vld [vmem:[%s2391_s10 + $0x40] sm:$0xff]  ;;  %v329_v21 = vld [vmem:[%s2391_s10 + $0x50] sm:$0xff]  ;;  %v328_v22 = vld [vmem:[%s2391_s10 + $0x48] sm:$0xff]  ;;  %426 = vperm.xlu0 %2283, %v388_v25  }
  0x17   : > { %v330_v23 = vld [vmem:[%s2391_s10 + $0x58] sm:$0xff]  ;;  %v347_v24 = vpack.c.bf16 %v329_v21, %v327_v20  ;;  %v323_v28 = vld [vmem:[%s2391_s10 + $0x20] sm:$0xff]  ;;  %v325_v29 = vld [vmem:[%s2391_s10 + $0x30] sm:$0xff]  ;;  %436 = vperm.xlu1 %2284, %v390_v41  }
  0x18   : > { %v348_v27 = vpack.c.bf16 %v330_v23, %v328_v22  ;;  %v324_v30 = vld [vmem:[%s2391_s10 + $0x28] sm:$0xff]  ;;  %v326_v31 = vld [vmem:[%s2391_s10 + $0x38] sm:$0xff]  ;;  %v345_v32 = vpack.c.bf16 %v325_v29, %v323_v28  ;;  %v319_v34 = vld [vmem:[%s2391_s10] sm:$0xff]  ;;  %446 = vperm.xlu2 %2285, %v392_v50  }
  0x19   : > { %711 = vmatpush.bf16.msra.mxu0 %v351_v12  ;;  %v346_v33 = vpack.c.bf16 %v326_v31, %v324_v30  ;;  %v321_v35 = vld [vmem:[%s2391_s10 + $0x10] sm:$0xff]  ;;  %v320_v36 = vld [vmem:[%s2391_s10 + $0x8] sm:$0xff]  ;;  %v322_v37 = vld [vmem:[%s2391_s10 + $0x18] sm:$0xff]  ;;  %s316_s10 = scalar_lea.vmem %s3460_s7, %s2222_s30 }
  0x1a   : > { %800 = vmatpush.bf16.msra.mxu1 %v352_v13  ;;  %v343_v38 = vpack.c.bf16 %v321_v35, %v319_v34  ;;  %v344_v39 = vpack.c.bf16 %v322_v37, %v320_v36  ;;  %v2226_v53 = vld [vmem:[%s3454_s1 + $0x18] sm:$0xff]  ;;  %v395_v56 = vld [vmem:[%s3455_s2 + $0x40] sm:$0xff]  ;;  %v416_v57 = vld [vmem:[%s3455_s2 + $0xe8] sm:$0xff] }
  0x1b   : > { %v414_v58 = vld [vmem:[%s3455_s2 + $0xd8] sm:$0xff]  ;;  %v2227_v59 = vld [vmem:[%s3454_s1 + $0x20] sm:$0xff]  ;;  %v409_v62 = vld [vmem:[%s3455_s2 + $0xb0] sm:$0xff] }
  0x1c   : > { %v398_v60 = vld [vmem:[%s3455_s2 + $0x58] sm:$0xff]  ;;  %v411_v61 = vld [vmem:[%s3455_s2 + $0xc0] sm:$0xff]  ;;  %v401_v63 = vld [vmem:[%s3455_s2 + $0x70] sm:$0xff] }
  0x1d   : > { %712 = vmatpush.bf16.msra.mxu0 %v349_v18  ;;  %v410_v0 = vld [vmem:[%s3455_s2 + $0xb8] sm:$0xff]  ;;  %v408_v2 = vld [vmem:[%s3455_s2 + $0xa8] sm:$0xff]  ;;  %v405_v5 = vld [vmem:[%s3455_s2 + $0x90] sm:$0xff] }
  0x1e   : > { %801 = vmatpush.bf16.msra.mxu1 %v350_v19  ;;  %451 = vperm.xlu0 %2283, %v393_v43   ;;  %v2228_v3 = vld [vmem:[%s3454_s1 + $0x28] sm:$0xff]  ;;  %v418_v4 = vld [vmem:[%s3455_s2 + $0xf8] sm:$0xff]  ;;  %v403_v6 = vld [vmem:[%s3455_s2 + $0x80] sm:$0xff] }
  0x1f   : > { %456 = vperm.xlu1 %2284, %v394_v44   ;;  %v413_v7 = vld [vmem:[%s3455_s2 + $0xd0] sm:$0xff]  ;;  %v404_v9 = vld [vmem:[%s3455_s2 + $0x88] sm:$0xff]  ;;  %v1066_v13 = vld [vmem:[%s3457_s4 + $0x20] sm:$0xff] }
  0x20   : > { %461 = vperm.xlu2 %2285, %v395_v56   ;;  %v2229_v8 = vld [vmem:[%s3454_s1 + $0x30] sm:$0xff]  ;;  %v1063_v10 = vld [vmem:[%s3457_s4 + $0x8] sm:$0xff]  ;;  %v407_v14 = vld [vmem:[%s3455_s2 + $0xa0] sm:$0xff] }
  0x21   : > { %713 = vmatpush.bf16.msra.mxu0 %v347_v24  ;;  %v412_v11 = vld [vmem:[%s3455_s2 + $0xc8] sm:$0xff]  ;;  %v1064_v12 = vld [vmem:[%s3457_s4 + $0x10] sm:$0xff]  ;;  %v2230_v15 = vld [vmem:[%s3454_s1 + $0x38] sm:$0xff] }
  0x22   : > { %802 = vmatpush.bf16.msra.mxu1 %v348_v27  ;;  %v1067_v16 = vld [vmem:[%s3457_s4 + $0x28] sm:$0xff]  ;;  %v1069_v17 = vld [vmem:[%s3457_s4 + $0x38] sm:$0xff]  ;;  %v1070_v19 = vld [vmem:[%s3457_s4 + $0x40] sm:$0xff] }
  0x23   : > { %v406_v18 = vld [vmem:[%s3455_s2 + $0x98] sm:$0xff]  ;;  %v1072_v20 = vld [vmem:[%s3457_s4 + $0x50] sm:$0xff]  ;;  %v1062_v22 = vld [vmem:[%s3457_s4] sm:$0xff] }
  0x24   : > { %v2231_v23 = vld [vmem:[%s3454_s1 + $0x40] sm:$0xff]  ;;  %v1073_v28 = vld [vmem:[%s3457_s4 + $0x58] sm:$0xff]  ;;  %v1075_v29 = vld [vmem:[%s3457_s4 + $0x68] sm:$0xff] }
  0x25   : > { %714 = vmatpush.bf16.msra.mxu0 %v345_v32  ;;  %v1065_v31 = vld [vmem:[%s3457_s4 + $0x18] sm:$0xff]  ;;  %v1076_v37 = vld [vmem:[%s3457_s4 + $0x70] sm:$0xff]  ;;  %v2232_v44 = vld [vmem:[%s3454_s1 + $0x48] sm:$0xff] }
  0x26   : > { %803 = vmatpush.bf16.msra.mxu1 %v346_v33  ;;  %466 = vperm.xlu0 %2283, %v396_v45   ;;  %v1068_v41 = vld [vmem:[%s3457_s4 + $0x30] sm:$0xff]  ;;  %v2619_v50 = vld [vmem:[%s3458_s5 + $0x18] sm:$0xff] }
  0x27   : > { %471 = vperm.xlu1 %2284, %v397_v48  }
  0x28   : > { %476 = vperm.xlu2 %2285, %v398_v60   ;;  %v2638_v60 = vld [vmem:[%s3458_s5 + $0x30] sm:$0xff] }
  0x29   : > { %715 = vmatpush.bf16.msra.mxu0 %v343_v38  ;;  %v2598_v38 = vld [vmem:[%s3458_s5] sm:$0xff]  ;;  %3524 = vst [vmem:[#allocation2_spill] sm:$0xff] %v2638_v60 }
  0x2a   : > { %804 = vmatpush.bf16.msra.mxu1 %v344_v39 }
  0x2c   : > { %2124 = vmatmul.msk.bf16.vlgmr.msra.gmra.mxu0 %vm659_vm0, %v2223_v40 }
  0x2d   : > { %2140 = vmatmul.msk.bf16.vlgmr.msra.gmra.mxu1 %vm659_vm0, %v2223_v40 }
  0x2e   : > { %481 = vperm.xlu0 %2283, %v399_v49   ;;  %v2614_v49 = vld [vmem:[%s3458_s5 + $0x8] sm:$0xff] }
  0x2f   : > { %486 = vperm.xlu1 %2284, %v400_v51  }
  0x30   : > { %491 = vperm.xlu2 %2285, %v401_v63   ;;  %v1074_v63 = vld [vmem:[%s3457_s4 + $0x60] sm:$0xff] }
  0x36   : > { %496 = vperm.xlu0 %2283, %v402_v52  }
  0x37   : > { %571 = vperm.xlu1 %2284, %v417_v54  }
  0x38   : > { %576 = vperm.xlu2 %2285, %v418_v4  }
  0x3c   : > { %2125 = vmatmul.msk.bf16.gmra.mxu0 %vm659_vm0, %v2224_v42 }
  0x3d   : > { %2141 = vmatmul.msk.bf16.gmra.mxu1 %vm659_vm0, %v2224_v42 }
  0x3e   : > { %561 = vperm.xlu0 %2283, %v415_v55  }
  0x3f   : > { %566 = vperm.xlu1 %2284, %v416_v57  }
  0x40   : > { %551 = vperm.xlu2 %2285, %v413_v7  }
  0x46   : > { %556 = vperm.xlu0 %2283, %v414_v58  }
  0x47   : > { %541 = vperm.xlu1 %2284, %v411_v61  }
  0x48   : > { %546 = vperm.xlu2 %2285, %v412_v11  }
  0x4c   : > { %2126 = vmatmul.msk.bf16.gmra.mxu0 %vm659_vm0, %v2225_v46 }
  0x4d   : > { %2142 = vmatmul.msk.bf16.gmra.mxu1 %vm659_vm0, %v2225_v46 }
  0x4e   : > { %531 = vperm.xlu0 %2283, %v409_v62  }
  0x4f   : > { %536 = vperm.xlu1 %2284, %v410_v0  }
  0x50   : > { %521 = vperm.xlu2 %2285, %v407_v14  }
  0x56   : > { %526 = vperm.xlu0 %2283, %v408_v2  }
  0x57   : > { %511 = vperm.xlu1 %2284, %v405_v5  }
  0x58   : > { %516 = vperm.xlu2 %2285, %v406_v18   ;;  %v2674_v18 = vld [vmem:[%s3458_s5 + $0x50] sm:$0xff] }
  0x59   : > { %3526 = vst [vmem:[#allocation4_spill] sm:$0xff] %v2674_v18 }
  0x5c   : > { %2127 = vmatmul.msk.bf16.gmra.mxu0 %vm659_vm0, %v2226_v53 }
  0x5d   : > { %2143 = vmatmul.msk.bf16.gmra.mxu1 %vm659_vm0, %v2226_v53  ;;  %v1071_v53 = vld [vmem:[%s3457_s4 + $0x48] sm:$0xff] }
  0x5e   : > { %501 = vperm.xlu0 %2283, %v403_v6  }
  0x5f   : > { %506 = vperm.xlu1 %2284, %v404_v9   ;;  %v2660_v9 = vld [vmem:[%s3458_s5 + $0x48] sm:$0xff] }
  0x60   : > { %1080 = vperm.xlu2 %2285, %v1062_v22   ;;  %3525 = vst [vmem:[#allocation3_spill] sm:$0xff] %v2660_v9 }
  0x66   : > { %1085 = vperm.xlu0 %2283, %v1063_v10  }
  0x67   : > { %1090 = vperm.xlu1 %2284, %v1064_v12   ;;  %v1077_v12 = vld [vmem:[%s3457_s4 + $0x78] sm:$0xff] }
  0x68   : > { %1095 = vperm.xlu2 %2285, %v1065_v31   ;;  %v2699_v31 = vld [vmem:[%s3458_s5 + $0x68] sm:$0xff] }
  0x69   : > { %3528 = vst [vmem:[#allocation6_spill] sm:$0xff] %v2699_v31 }
  0x6a   : > { %v442_v62 = vpop.permute.xlu2 %441 }
  0x6c   : > { %2128 = vmatmul.msk.bf16.gmra.mxu0 %vm659_vm0, %v2227_v59 }
  0x6d   : > { %2144 = vmatmul.msk.bf16.gmra.mxu1 %vm659_vm0, %v2227_v59  ;;  %v2633_v59 = vld [vmem:[%s3458_s5 + $0x20] sm:$0xff] }
  0x6e   : > { %1100 = vperm.xlu0 %2283, %v1066_v13  }
  0x6f   : > { %1105 = vperm.xlu1 %2284, %v1067_v16  }
  0x70   : > { %1110 = vperm.xlu2 %2285, %v1068_v41  }
  0x72   : > { %v447_v11 = vpop.permute.xlu2 %446 }
  0x76   : > { %1115 = vperm.xlu0 %2283, %v1069_v17  }
  0x77   : > { %1120 = vperm.xlu1 %2284, %v1070_v19   ;;  %v2679_v19 = vld [vmem:[%s3458_s5 + $0x60] sm:$0xff] }
  0x78   : > { %1125 = vperm.xlu2 %2285, %v1071_v53   ;;  %3527 = vst [vmem:[#allocation5_spill] sm:$0xff] %v2679_v19 }
  0x7c   : > { %2129 = vmatmul.msk.bf16.gmra.mxu0 %vm659_vm0, %v2228_v3 }
  0x7d   : > { %2145 = vmatmul.msk.bf16.gmra.mxu1 %vm659_vm0, %v2228_v3  ;;  %v2233_v3 = vld [vmem:[%s3454_s1 + $0x50] sm:$0xff] }
  0x7e   : > { %1130 = vperm.xlu0 %2283, %v1072_v20  }
  0x7f   : > { %1135 = vperm.xlu1 %2284, %v1073_v28  }
  0x80   : > { %v422_v21 = vpop.permute.xlu0 %421  ;;  %1140 = vperm.xlu2 %2285, %v1074_v63  }
  0x81   : > { %v432_v40 = vpop.permute.xlu1 %431 }
  0x86   : > { %1145 = vperm.xlu0 %2283, %v1075_v29  }
  0x87   : > { %1150 = vperm.xlu1 %2284, %v1076_v37  }
  0x88   : > { %v427_v30 = vpop.permute.xlu0 %426  ;;  %1155 = vperm.xlu2 %2285, %v1077_v12  }
  0x89   : > { %v437_v52 = vpop.permute.xlu1 %436 }
  0x8c   : > { %2130 = vmatmul.msk.bf16.gmra.mxu0 %vm659_vm0, %v2229_v8 }
  0x8d   : > { %2146 = vmatmul.msk.bf16.gmra.mxu1 %vm659_vm0, %v2229_v8  ;;  %v2655_v8 = vld [vmem:[%s3458_s5 + $0x38] sm:$0xff] }
  0x8e   : > { %1516 = vperm.xlu0 %2283, %v2598_v38  }
  0x8f   : > { %1521 = vperm.xlu1 %2284, %v2614_v49  }
  0x90   : > { %v452_v28 = vpop.permute.xlu0 %451 }
  0x96   : > { %1531 = vperm.xlu0 %2283, %v2619_v50  }
  0x97   : > { %1536 = vperm.xlu1 %2284, %v2633_v59  }
  0x9c   : > { %2131 = vmatmul.msk.bf16.gmra.mxu0 %vm659_vm0, %v2230_v15 }
  0x9d   : > { %2147 = vmatmul.msk.bf16.gmra.mxu1 %vm659_vm0, %v2230_v15 }
  0x9e   : > { %1546 = vperm.xlu0 %2283, %v2638_v60  }
  0x9f   : > { %1551 = vperm.xlu1 %2284, %v2655_v8  }
  0xa6   : > { %1561 = vperm.xlu0 %2283, %v2660_v9  }
  0xa7   : > { %1566 = vperm.xlu1 %2284, %v2674_v18  }
  0xa9   : > { %v717_v24 = vpop.f32.mrf.mxu0 }
  0xaa   : > { %v718_v25 = vadd.f32 %v717_v24, %v422_v21  ;;  %v806_v26 = vpop.f32.mrf.mxu1  ;;  %v2234_v24 = vld [vmem:[%s3454_s1 + $0x58] sm:$0xff] }
  0xab   : > { %v2577_v27 = vadd.f32 %v806_v26, %v422_v21 }
  0xac   : > { %2132 = vmatmul.msk.bf16.gmra.mxu0 %vm659_vm0, %v2231_v23  ;;  %v886_v33 = vmul.f32 0.2, %v718_v25 }
  0xad   : > { %2148 = vmatmul.msk.bf16.gmra.mxu1 %vm659_vm0, %v2231_v23  ;;  %v2686_v23 = vld [vmem:[%s3458_s5 + $0x10] sm:$0xff] }
  0xae   : > { %v950_v42 = vmax.f32 %v718_v25, %v886_v33  ;;  %1576 = vperm.xlu0 %2283, %v2679_v19   ;;  %1526 = vperm.xlu2 %2285, %v2686_v23  }
  0xaf   : > { %1581 = vperm.xlu1 %2284, %v2699_v31  }
  0xb1   : > { %v719_v32 = vpop.f32.mrf.mxu0 }
  0xb2   : > { %v720_v34 = vadd.f32 %v719_v32, %v427_v30  ;;  %v808_v35 = vpop.f32.mrf.mxu1  ;;  %v2704_v32 = vld [vmem:[%s3458_s5 + $0x78] sm:$0xff] }
  0xb3   : > { %v2590_v36 = vadd.f32 %v808_v35, %v427_v30  ;;  %3529 = vst [vmem:[#allocation7_spill] sm:$0xff] %v2704_v32  ;;  %v2716_v35 = vpop.permute.xlu1 %456 }
  0xb4   : > { %v888_v39 = vmul.f32 0.2, %v720_v34 }
  0xb6   : > { %v952_v43 = vmax.f32 %v720_v34, %v888_v39  ;;  %1591 = vperm.xlu0 %2283, %v2704_v32   ;;  %v2713_v34 = vld [vmem:[%s3458_s5 + $0x28] sm:$0xff] }
  0xb7   : > { %3530 = vst [vmem:[#allocation8_spill] sm:$0xff] %v2713_v34  ;;  %1541 = vperm.xlu2 %2285, %v2713_v34  }
  0xb8   : > { %v2607_v45 = vpack.c.bf16 %v952_v43, %v950_v42 }
  0xb9   : > { %v722_v46 = vpop.f32.mrf.mxu0 }
  0xba   : > { %v811_v47 = vpop.f32.mrf.mxu1  ;;  %v723_v51 = vadd.f32 %v722_v46, %v432_v40  ;;  %v2721_v46 = vpop.permute.xlu0 %466 }
  0xbb   : > { %v2609_v48 = vadd.f32 %v811_v47, %v432_v40  ;;  %v2726_v47 = vld [vmem:[%s3458_s5 + $0x40] sm:$0xff] }
  0xbc   : > { %2133 = vmatmul.msk.bf16.gmra.mxu0 %vm659_vm0, %v2232_v44  ;;  %v890_v55 = vmul.f32 0.2, %v723_v51  ;;  %3531 = vst [vmem:[#allocation9_spill] sm:$0xff] %v2726_v47 }
  0xbd   : > { %2149 = vmatmul.msk.bf16.gmra.mxu1 %vm659_vm0, %v2232_v44 }
  0xbe   : > { %v954_v0 = vmax.f32 %v723_v51, %v890_v55  ;;  %v2235_v51 = vld [vmem:[%s3454_s1 + $0x60] sm:$0xff]  ;;  %v2738_v55 = vpop.permute.xlu1 %471 }
  0xbf   : > { %1556 = vperm.xlu2 %2285, %v2726_v47  }
  0xc1   : > { %v724_v54 = vpop.f32.mrf.mxu0 }
  0xc2   : > { %v725_v56 = vadd.f32 %v724_v54, %v437_v52  ;;  %v813_v57 = vpop.f32.mrf.mxu1 }
  0xc3   : > { %v2628_v58 = vadd.f32 %v813_v57, %v437_v52  ;;  %v2748_v57 = vpop.permute.xlu0 %481 }
  0xc4   : > { %v892_v61 = vmul.f32 0.2, %v725_v56 }
  0xc6   : > { %v956_v2 = vmax.f32 %v725_v56, %v892_v61  ;;  %v2745_v56 = vld [vmem:[%s3458_s5 + $0x58] sm:$0xff]  ;;  %v2754_v63 = vpop.permute.xlu1 %486 }
  0xc7   : > { %3532 = vst [vmem:[#allocation10_spill] sm:$0xff] %v2745_v56  ;;  %1571 = vperm.xlu2 %2285, %v2745_v56  }
  0xc8   : > { %v2648_v4 = vpack.c.bf16 %v956_v2, %v954_v0  ;;  %v2759_v0 = vld [vmem:[%s3458_s5 + $0x70] sm:$0xff]  ;;  %v2236_v2 = vld [vmem:[%s3454_s1 + $0x68] sm:$0xff] }
  0xc9   : > { %v727_v5 = vpop.f32.mrf.mxu0  ;;  %3533 = vst [vmem:[#allocation11_spill] sm:$0xff] %v2759_v0 }
  0xca   : > { %v816_v6 = vpop.f32.mrf.mxu1  ;;  %v728_v10 = vadd.f32 %v727_v5, %v442_v62  ;;  %v2765_v5 = vpop.permute.xlu2 %461 }
  0xcb   : > { %v2650_v7 = vadd.f32 %v816_v6, %v442_v62 }
  0xcc   : > { %2134 = vmatmul.msk.bf16.gmra.mxu0 %vm659_vm0, %v2233_v3  ;;  %v894_v14 = vmul.f32 0.2, %v728_v10 }
  0xcd   : > { %2150 = vmatmul.msk.bf16.gmra.mxu1 %vm659_vm0, %v2233_v3 }
  0xce   : > { %v958_v21 = vmax.f32 %v728_v10, %v894_v14  ;;  %v2769_v10 = vpop.permute.xlu0 %496 }
  0xcf   : > { %1586 = vperm.xlu2 %2285, %v2759_v0  }
  0xd1   : > { %v729_v13 = vpop.f32.mrf.mxu0 }
  0xd2   : > { %v730_v15 = vadd.f32 %v729_v13, %v447_v11  ;;  %v818_v16 = vpop.f32.mrf.mxu1  ;;  %v2777_v14 = vpop.permute.xlu2 %476 }
  0xd3   : > { %v2669_v17 = vadd.f32 %v818_v16, %v447_v11  ;;  %v2773_v11 = vpop.permute.xlu1 %571  ;;  %v887_v16 = vmul.f32 0.2, %v2577_v27 }
  0xd4   : > { %v896_v20 = vmul.f32 0.2, %v730_v15 }
  0xd5   : > { %v897_v34 = vmul.f32 0.2, %v2669_v17 }
  0xd6   : > { %v960_v22 = vmax.f32 %v730_v15, %v896_v20  ;;  %v2779_v15 = vpop.permute.xlu0 %561  ;;  %v2237_v20 = vld [vmem:[%s3454_s1 + $0x70] sm:$0xff] }
  0xd7   : > { %3534 = vst [vmem:[#allocation12_spill] sm:$0xff] %v2779_v15 }
  0xd8   : > { %v2692_v25 = vpack.c.bf16 %v960_v22, %v958_v21  ;;  %v889_v21 = vmul.f32 0.2, %v2590_v36 }
  0xd9   : > { %v732_v26 = vpop.f32.mrf.mxu0 }
  0xda   : > { %v821_v29 = vpop.f32.mrf.mxu1  ;;  %v733_v33 = vadd.f32 %v732_v26, %v452_v28 }
  0xdb   : > { %v2694_v30 = vadd.f32 %v821_v29, %v452_v28  ;;  %v2786_v22 = vpop.permute.xlu1 %566  ;;  %v951_v28 = vmax.f32 %v2577_v27, %v887_v16  ;;  %v953_v29 = vmax.f32 %v2590_v36, %v889_v21  ;;  %v893_v36 = vmul.f32 0.2, %v2628_v58 }
  0xdc   : > { %2135 = vmatmul.msk.bf16.gmra.mxu0 %vm659_vm0, %v2234_v24  ;;  %v898_v39 = vmul.f32 0.2, %v733_v33  ;;  %3535 = vst [vmem:[#allocation13_spill] sm:$0xff] %v2786_v22 }
  0xdd   : > { %2151 = vmatmul.msk.bf16.gmra.mxu1 %vm659_vm0, %v2234_v24 }
  0xde   : > { %v962_v43 = vmax.f32 %v733_v33, %v898_v39  ;;  %v2794_v33 = vpop.permute.xlu2 %491  ;;  %v2798_v39 = vpack.c.bf16 %v953_v29, %v951_v28  ;;  %v957_v29 = vmax.f32 %v2628_v58, %v893_v36 }
  0xe1   : > { %v734_v37 = vpop.f32.mrf.mxu0 }
  0xe2   : > { %v735_v40 = vadd.f32 %v734_v37, %v2716_v35  ;;  %v2719_v41 = vpop.f32.mrf.mxu1  ;;  %v2796_v37 = vpop.permute.xlu0 %556 }
  0xe3   : > { %3536 = vst [vmem:[#allocation14_spill] sm:$0xff] %v2796_v37 }
  0xe4   : > { %v900_v42 = vmul.f32 0.2, %v735_v40 }
  0xe6   : > { %v964_v44 = vmax.f32 %v735_v40, %v900_v42  ;;  %v2805_v27 = vpop.permute.xlu2 %576 }
  0xe7   : > { %3538 = vst [vmem:[#allocation16_spill] sm:$0xff] %v2805_v27 }
  0xe8   : > { %v2732_v52 = vpack.c.bf16 %v964_v44, %v962_v43  ;;  %v2802_v43 = vpop.permute.xlu1 %541  ;;  %v891_v44 = vmul.f32 0.2, %v2609_v48 }
  0xe9   : > { %v2734_v53 = vpop.f32.mrf.mxu0  ;;  %3537 = vst [vmem:[#allocation15_spill] sm:$0xff] %v2802_v43  ;;  %v895_v43 = vmul.f32 0.2, %v2650_v7 }
  0xea   : > { %v2736_v54 = vpop.f32.mrf.mxu1  ;;  %v955_v21 = vmax.f32 %v2609_v48, %v891_v44  ;;  %v738_v37 = vadd.f32 %v2734_v53, %v2765_v5  ;;  %v899_v53 = vmul.f32 0.2, %v2694_v30 }
  0xec   : > { %2136 = vmatmul.msk.bf16.gmra.mxu0 %vm659_vm0, %v2235_v51  ;;  %v2822_v32 = vpack.c.bf16 %v957_v29, %v955_v21 }
  0xed   : > { %2152 = vmatmul.msk.bf16.gmra.mxu1 %vm659_vm0, %v2235_v51  ;;  %v2238_v51 = vld [vmem:[%s3454_s1 + $0x78] sm:$0xff] }
  0xee   : > { %v2827_v31 = vpop.permute.xlu2 %551 }
  0xef   : > { %3539 = vst [vmem:[#allocation17_spill] sm:$0xff] %v2827_v31 }
  0xf0   : > { %v2817_v28 = vpop.permute.xlu1 %536 }
  0xf1   : > { %v2750_v61 = vpop.f32.mrf.mxu0 }
  0xf2   : > { %v2752_v62 = vpop.f32.mrf.mxu1 }
  0xf9   : > { %v742_v3 = vpop.f32.mrf.mxu0 }
  0xfa   : > { %v2767_v6 = vpop.f32.mrf.mxu1 }
  0xfc   : > { %2137 = vmatmul.msk.bf16.gmra.mxu0 %vm659_vm0, %v2236_v2 }
  0xfd   : > { %2153 = vmatmul.msk.bf16.gmra.mxu1 %vm659_vm0, %v2236_v2  ;;  %v2811_v2 = vpop.permute.xlu0 %531 }
 0x101   : > { %v744_v12 = vpop.f32.mrf.mxu0 }
 0x102   : > { %v2775_v13 = vpop.f32.mrf.mxu1 }
 0x105   : > { %v2829_v47 = vpop.permute.xlu0 %526 }
 0x109   : > { %v747_v24 = vpop.f32.mrf.mxu0 }
 0x10a   : > { %v2788_v26 = vpop.f32.mrf.mxu1  ;;  %v748_v56 = vadd.f32 %v747_v24, %v2748_v57  ;;  %v2834_v24 = vpop.permute.xlu1 %511 }
 0x10c   : > { %2138 = vmatmul.msk.bf16.gmra.mxu0 %vm659_vm0, %v2237_v20  ;;  %v910_v21 = vmul.f32 0.2, %v748_v56 }
 0x10d   : > { %2154 = vmatmul.msk.bf16.gmra.mxu1 %vm659_vm0, %v2237_v20 }
 0x10e   : > { %v974_v27 = vmax.f32 %v748_v56, %v910_v21  ;;  %v902_v56 = vmul.f32 0.2, %v738_v37 }
 0x111   : > { %v749_v40 = vpop.f32.mrf.mxu0 }
 0x112   : > { %v2800_v42 = vpop.f32.mrf.mxu1  ;;  %v750_v0 = vadd.f32 %v749_v40, %v2754_v63 }
 0x114   : > { %v912_v58 = vmul.f32 0.2, %v750_v0 }
 0x116   : > { %v976_v31 = vmax.f32 %v750_v0, %v912_v58  ;;  %v2846_v58 = vpop.permute.xlu2 %546 }
 0x117   : > { %3540 = vst [vmem:[#allocation18_spill] sm:$0xff] %v2846_v58 }
 0x118   : > { %v1026_v0 = vpack.c.bf16 %v976_v31, %v974_v27  ;;  %v963_v27 = vmax.f32 %v2694_v30, %v899_v53 }
 0x119   : > { %v752_v16 = vpop.f32.mrf.mxu0 }
 0x11a   : > { %v2813_v20 = vpop.f32.mrf.mxu1  ;;  %v753_v1 = vadd.f32 %v752_v16, %v2794_v33  ;;  %v743_v16 = vadd.f32 %v742_v3, %v2738_v55 }
 0x11c   : > { %2139 = vmatmul.msk.bf16.gmra.mxu0 %vm659_vm0, %v2238_v51  ;;  %v914_v9 = vmul.f32 0.2, %v753_v1  ;;  %v906_v3 = vmul.f32 0.2, %v743_v16 }
 0x11d   : > { %2155 = vmatmul.msk.bf16.gmra.mxu1 %vm659_vm0, %v2238_v51  ;;  %v745_v51 = vadd.f32 %v744_v12, %v2777_v14 }
 0x11e   : > { %v978_v29 = vmax.f32 %v753_v1, %v914_v9  ;;  %v959_v9 = vmax.f32 %v2650_v7, %v895_v43  ;;  %v970_v21 = vmax.f32 %v743_v16, %v906_v3 }
 0x11f   : > { %v908_v60 = vmul.f32 0.2, %v745_v51 }
 0x121   : > { %v754_v19 = vpop.f32.mrf.mxu0 }
 0x122   : > { %v755_v48 = vadd.f32 %v754_v19, %v2769_v10  ;;  %v843_v44 = vpop.f32.mrf.mxu1  ;;  %v740_v19 = vadd.f32 %v2750_v61, %v2721_v46 }
 0x123   : > { %v844_v30 = vadd.f32 %v843_v44, %v2769_v10  ;;  %v834_v10 = vadd.f32 %v2775_v13, %v2777_v14 }
 0x124   : > { %v916_v36 = vmul.f32 0.2, %v755_v48  ;;  %v904_v61 = vmul.f32 0.2, %v740_v19 }
 0x126   : > { %v980_v40 = vmax.f32 %v755_v48, %v916_v36  ;;  %v824_v48 = vadd.f32 %v2719_v41, %v2716_v35  ;;  %v972_v36 = vmax.f32 %v745_v51, %v908_v60  ;;  %v968_v35 = vmax.f32 %v740_v19, %v904_v61  ;;  %v507_v60 = vpop.permute.xlu1 %506 }
 0x127   : > { %v966_v51 = vmax.f32 %v738_v37, %v902_v56  ;;  %v842_v19 = vadd.f32 %v2813_v20, %v2794_v33 }
 0x128   : > { %v1028_v18 = vpack.c.bf16 %v980_v40, %v978_v29  ;;  %v2848_v29 = vpop.permute.xlu0 %501  ;;  %v961_v40 = vmax.f32 %v2669_v17, %v897_v34  ;;  %v901_v43 = vmul.f32 0.2, %v824_v48  ;;  %v1024_v41 = vpack.c.bf16 %v972_v36, %v970_v21 }
 0x129   : > { %v757_v12 = vpop.f32.mrf.mxu0  ;;  %v1022_v22 = vpack.c.bf16 %v968_v35, %v966_v51 }
 0x12a   : > { %v2841_v1 = vpop.f32.mrf.mxu1  ;;  %1238 = vmatpush.bf16.msra.mxu2 %v1028_v18  ;;  %v758_v18 = vadd.f32 %v757_v12, %v2848_v29  ;;  %v2853_v7 = vpack.c.bf16 %v961_v40, %v959_v9  ;;  %v965_v16 = vmax.f32 %v824_v48, %v901_v43  ;;  %v837_v48 = vadd.f32 %v2788_v26, %v2748_v57 }
 0x12b   : > { %v832_v40 = vadd.f32 %v2767_v6, %v2738_v55  ;;  %v827_v57 = vadd.f32 %v2736_v54, %v2765_v5  ;;  %v2240_v54 = vld [vmem:[%s3456_s3 + $0x4] sm:$0xf0] }
 0x12c   : > { %v918_v58 = vmul.f32 0.2, %v758_v18  ;;  %v2856_v9 = vpack.c.bf16 %v965_v16, %v963_v27  ;;  %v911_v20 = vmul.f32 0.2, %v837_v48 }
 0x12d   : > { %v907_v26 = vmul.f32 0.2, %v832_v40 }
 0x12e   : > { %1239 = vmatpush.bf16.msra.mxu2 %v1026_v0  ;;  %v982_v3 = vmax.f32 %v758_v18, %v918_v58  ;;  %v2858_v0 = vpop.permute.xlu2 %521  ;;  %v917_v58 = vmul.f32 0.2, %v844_v30  ;;  %v975_v5 = vmax.f32 %v837_v48, %v911_v20  ;;  %v903_v18 = vmul.f32 0.2, %v827_v57 }
 0x12f   : > { %v971_v35 = vmax.f32 %v832_v40, %v907_v26  ;;  %v2242_v26 = vld [vmem:[%s3456_s3 + $0x14] sm:$0xf0] }
 0x130   : > { %v981_v53 = vmax.f32 %v844_v30, %v917_v58 }
 0x131   : > { %v759_v31 = vpop.f32.mrf.mxu0 }
 0x132   : > { %v760_v15 = vadd.f32 %v759_v31, %v507_v60  ;;  %v848_v17 = vpop.f32.mrf.mxu1  ;;  %1240 = vmatpush.bf16.msra.mxu2 %v1024_v41 }
 0x134   : > { %v920_v34 = vmul.f32 0.2, %v760_v15 }
 0x136   : > { %v984_v12 = vmax.f32 %v760_v15, %v920_v34  ;;  %1241 = vmatpush.bf16.msra.mxu2 %v1022_v22  ;;  %v839_v15 = vadd.f32 %v2800_v42, %v2754_v63  ;;  %v915_v22 = vmul.f32 0.2, %v842_v19  ;;  %v829_v63 = vadd.f32 %v2752_v62, %v2721_v46  ;;  %v517_v55 = vpop.permute.xlu2 %516 }
 0x137   : > { %v909_v42 = vmul.f32 0.2, %v834_v10  ;;  %v849_v34 = vadd.f32 %v848_v17, %v507_v60 }
 0x138   : > { %v2863_v37 = vpack.c.bf16 %v984_v12, %v982_v3  ;;  %v979_v44 = vmax.f32 %v842_v19, %v915_v22  ;;  %v905_v43 = vmul.f32 0.2, %v829_v63 }
 0x139   : > { %v762_v61 = vpop.f32.mrf.mxu0  ;;  %v973_v31 = vmax.f32 %v834_v10, %v909_v42 }
 0x13a   : > { %v851_v36 = vpop.f32.mrf.mxu1  ;;  %1242 = vmatpush.bf16.msra.mxu2 %v2732_v52  ;;  %v763_v33 = vadd.f32 %v762_v61, %v2834_v24  ;;  %v913_v52 = vmul.f32 0.2, %v839_v15  ;;  %v1029_v46 = vpack.c.bf16 %v981_v53, %v979_v44  ;;  %v967_v61 = vmax.f32 %v827_v57, %v903_v18 }
 0x13b   : > { %v852_v16 = vadd.f32 %v851_v36, %v2834_v24  ;;  %v969_v48 = vmax.f32 %v829_v63, %v905_v43  ;;  %v2166_v63 = vld [vmem:[%s3456_s3 + $0x10] sm:$0xf] }
 0x13c   : > { %v922_v56 = vmul.f32 0.2, %v763_v33  ;;  %v977_v21 = vmax.f32 %v839_v15, %v913_v52 }
 0x13e   : > { %1243 = vmatpush.bf16.msra.mxu2 %v2692_v25  ;;  %v2158_v25 = vld [vmem:[%s3456_s3] sm:$0xf]  ;;  %v986_v27 = vmax.f32 %v763_v33, %v922_v56  ;;  %v1027_v12 = vpack.c.bf16 %v977_v21, %v975_v5  ;;  %v1023_v33 = vpack.c.bf16 %v969_v48, %v967_v61 }
 0x13f   : > { %v2887_v41 = vor.u32 %v2240_v54, %v2158_v25 }
 0x141   : > { %v764_v6 = vpop.f32.mrf.mxu0 }
 0x142   : > { %v765_v13 = vadd.f32 %v764_v6, %v517_v55  ;;  %v853_v14 = vpop.f32.mrf.mxu1  ;;  %1244 = vmatpush.bf16.msra.mxu2 %v2648_v4  ;;  %v847_v4 = vadd.f32 %v2841_v1, %v2848_v29  ;;  %v921_v1 = vmul.f32 0.2, %v849_v34  ;;  %v923_v29 = vmul.f32 0.2, %v852_v16 }
 0x143   : > { %v854_v3 = vadd.f32 %v853_v14, %v517_v55  ;;  %v2910_v14 = vor.u32 %v2242_v26, %v2166_v63 }
 0x144   : > { %v924_v62 = vmul.f32 0.2, %v765_v13  ;;  %v919_v15 = vmul.f32 0.2, %v847_v4  ;;  %v985_v36 = vmax.f32 %v849_v34, %v921_v1  ;;  %v987_v40 = vmax.f32 %v852_v16, %v923_v29  ;;  %v2246_v29 = vld [vmem:[%s3456_s3 + $0x34] sm:$0xf0] }
 0x145   : > { %v925_v58 = vmul.f32 0.2, %v854_v3 }
 0x146   : > { %v988_v51 = vmax.f32 %v765_v13, %v924_v62  ;;  %1245 = vmatpush.bf16.msra.mxu2 %v2607_v45  ;;  %v1025_v45 = vpack.c.bf16 %v973_v31, %v971_v35  ;;  %v983_v24 = vmax.f32 %v847_v4, %v919_v15 }
 0x147   : > { %v989_v10 = vmax.f32 %v854_v3, %v925_v58 }
 0x148   : > { %v2893_v19 = vpack.c.bf16 %v988_v51, %v986_v27  ;;  %v2908_v55 = vpack.c.bf16 %v985_v36, %v983_v24  ;;  %v2174_v51 = vld [vmem:[%s3456_s3 + $0x20] sm:$0xf]  ;;  %v2248_v36 = vld [vmem:[%s3456_s3 + $0x44] sm:$0xf0] }
 0x149   : > { %v767_v30 = vpop.f32.mrf.mxu0  ;;  %1246 = vmatmul.bf16.vlgmr.msra.gmra.mxu2 %v2887_v41  ;;  %v2906_v42 = vpack.c.bf16 %v989_v10, %v987_v40 }
 0x14a   : > { %1336 = vmatpush.bf16.msrb.mxu2 %v1029_v46  ;;  %v856_v22 = vpop.f32.mrf.mxu1  ;;  %v768_v17 = vadd.f32 %v767_v30, %v2858_v0 }
 0x14b   : > { %v857_v60 = vadd.f32 %v856_v22, %v2858_v0 }
 0x14c   : > { %v926_v44 = vmul.f32 0.2, %v768_v17 }
 0x14d   : > { %v927_v20 = vmul.f32 0.2, %v857_v60 }
 0x14e   : > { %1337 = vmatpush.bf16.msrb.mxu2 %v1027_v12  ;;  %v990_v25 = vmax.f32 %v768_v17, %v926_v44  ;;  %v2190_v17 = vld [vmem:[%s3456_s3 + $0x40] sm:$0xf]  ;;  %v2198_v44 = vld [vmem:[%s3456_s3 + $0x50] sm:$0xf] }
 0x14f   : > { %v991_v56 = vmax.f32 %v857_v60, %v927_v20  ;;  %v2959_v10 = vor.u32 %v2248_v36, %v2190_v17 }
 0x151   : > { %v769_v52 = vpop.f32.mrf.mxu0 }
 0x152   : > { %1338 = vmatpush.bf16.msrb.mxu2 %v1025_v45  ;;  %v770_v53 = vadd.f32 %v769_v52, %v2829_v47  ;;  %v858_v57 = vpop.f32.mrf.mxu1 }
 0x153   : > { %v859_v0 = vadd.f32 %v858_v57, %v2829_v47  ;;  %v2319_v57 = vmov 1  }
 0x154   : > { %v928_v6 = vmul.f32 0.2, %v770_v53  ;;  %2286 = vset.pattern.permute.xlu1 %v2319_v57  ;;  %2288 = vset.pattern.permute.xlu0 %v2319_v57 }
 0x155   : > { %v929_v13 = vmul.f32 0.2, %v859_v0  ;;  %1669 = vperm.xlu1 %2286, %v2598_v38   ;;  %1677 = vperm.xlu0 %2288, %v2686_v23  }
 0x156   : > { %1339 = vmatpush.bf16.msrb.mxu2 %v1023_v33  ;;  %v992_v54 = vmax.f32 %v770_v53, %v928_v6  ;;  %v2250_v53 = vld [vmem:[%s3456_s3 + $0x54] sm:$0xf0]  ;;  %2287 = vset.pattern.permute.xlu2 %v2319_v57 }
 0x157   : > { %v993_v5 = vmax.f32 %v859_v0, %v929_v13  ;;  %v2972_v63 = vor.u32 %v2250_v53, %v2198_v44  ;;  %1673 = vperm.xlu2 %2287, %v2614_v49  }
 0x158   : > { %v2913_v21 = vpack.c.bf16 %v992_v54, %v990_v25  ;;  %v3542_v54 = vld [vmem:[#allocation12_spill] sm:$0xff] }
 0x159   : > { %v772_v46 = vpop.f32.mrf.mxu0  ;;  %1251 = vmatmul.bf16.gmra.mxu2 %v2910_v14  ;;  %v2916_v47 = vpack.c.bf16 %v993_v5, %v991_v56  ;;  %v3541_v56 = vld [vmem:[#allocation13_spill] sm:$0xff] }
 0x15a   : > { %1340 = vmatpush.bf16.msrb.mxu2 %v2856_v9  ;;  %v861_v62 = vpop.f32.mrf.mxu1  ;;  %v773_v43 = vadd.f32 %v772_v46, %v2811_v2 }
 0x15b   : > { %v862_v18 = vadd.f32 %v861_v62, %v2811_v2 }
 0x15c   : > { %v930_v4 = vmul.f32 0.2, %v773_v43 }
 0x15d   : > { %v931_v35 = vmul.f32 0.2, %v862_v18  ;;  %1681 = vperm.xlu1 %2286, %v2619_v50   ;;  %1697 = vperm.xlu0 %2288, %v2655_v8  }
 0x15e   : > { %1341 = vmatpush.bf16.msrb.mxu2 %v2853_v7  ;;  %v2244_v7 = vld [vmem:[%s3456_s3 + $0x24] sm:$0xf0]  ;;  %v994_v12 = vmax.f32 %v773_v43, %v930_v4  ;;  %v3544_v4 = vld [vmem:[#allocation14_spill] sm:$0xff] }
 0x15f   : > { %v2931_v3 = vor.u32 %v2244_v7, %v2174_v51  ;;  %1685 = vperm.xlu2 %2287, %v2633_v59   ;;  %v3545_v7 = vld [vmem:[#allocation8_spill] sm:$0xff] }
 0x161   : > { %v774_v31 = vpop.f32.mrf.mxu0 }
 0x162   : > { %1342 = vmatpush.bf16.msrb.mxu2 %v2822_v32  ;;  %v775_v9 = vadd.f32 %v774_v31, %v2817_v28  ;;  %v863_v27 = vpop.f32.mrf.mxu1  ;;  %v995_v32 = vmax.f32 %v862_v18, %v931_v35  ;;  %v3543_v18 = vld [vmem:[#allocation16_spill] sm:$0xff]  ;;  %v2206_v35 = vld [vmem:[%s3456_s3 + $0x60] sm:$0xf]  ;;  %v2252_v31 = vld [vmem:[%s3456_s3 + $0x64] sm:$0xf0] }
 0x163   : > { %v864_v34 = vadd.f32 %v863_v27, %v2817_v28 }
 0x164   : > { %v932_v2 = vmul.f32 0.2, %v775_v9 }
 0x165   : > { %v933_v16 = vmul.f32 0.2, %v864_v34  ;;  %1689 = vperm.xlu1 %2286, %v3545_v7  }
 0x166   : > { %1343 = vmatpush.bf16.msrb.mxu2 %v2798_v39  ;;  %v996_v30 = vmax.f32 %v775_v9, %v932_v2  ;;  %v2182_v39 = vld [vmem:[%s3456_s3 + $0x30] sm:$0xf]  ;;  %v2994_v2 = vor.u32 %v2252_v31, %v2206_v35 }
 0x167   : > { %v997_v61 = vmax.f32 %v864_v34, %v933_v16  ;;  %v2946_v58 = vor.u32 %v2246_v29, %v2182_v39  ;;  %v3546_v34 = vld [vmem:[#allocation4_spill] sm:$0xff]  ;;  %v3548_v39 = vld [vmem:[#allocation2_spill] sm:$0xff] }
 0x168   : > { %v2933_v48 = vpack.c.bf16 %v996_v30, %v994_v12  ;;  %1709 = vperm.xlu0 %2288, %v3546_v34   ;;  %1693 = vperm.xlu2 %2287, %v3548_v39   ;;  %v3549_v29 = vld [vmem:[#allocation18_spill] sm:$0xff] }
 0x169   : > { %v777_v15 = vpop.f32.mrf.mxu0  ;;  %1256 = vmatmul.bf16.gmra.mxu2 %v2931_v3  ;;  %v2936_v22 = vpack.c.bf16 %v997_v61, %v995_v32  ;;  %v3547_v32 = vld [vmem:[#allocation17_spill] sm:$0xff] }
 0x16a   : > { %v2938_v1 = vpop.f32.mrf.mxu1 }
 0x171   : > { %v779_v28 = vpop.f32.mrf.mxu0 }
 0x172   : > { %v2949_v60 = vpop.f32.mrf.mxu1  ;;  %v780_v17 = vadd.f32 %v779_v28, %v3549_v29 }
 0x179   : > { %v782_v45 = vpop.f32.mrf.mxu0  ;;  %1261 = vmatmul.bf16.gmra.mxu2 %v2946_v58 }
 0x17a   : > { %v2957_v40 = vpop.f32.mrf.mxu1  ;;  %v783_v16 = vadd.f32 %v782_v45, %v3547_v32 }
 0x17c   : > { %v938_v53 = vmul.f32 0.2, %v783_v16 }
 0x17e   : > { %v1002_v28 = vmax.f32 %v783_v16, %v938_v53 }
 0x181   : > { %v784_v24 = vpop.f32.mrf.mxu0 }
 0x182   : > { %v2962_v20 = vpop.f32.mrf.mxu1  ;;  %v785_v9 = vadd.f32 %v784_v24, %v3544_v4 }
 0x184   : > { %v940_v36 = vmul.f32 0.2, %v785_v9 }
 0x189   : > { %v787_v33 = vpop.f32.mrf.mxu0  ;;  %1266 = vmatmul.bf16.gmra.mxu2 %v2959_v10 }
 0x18a   : > { %v2975_v26 = vpop.f32.mrf.mxu1  ;;  %v788_v5 = vadd.f32 %v787_v33, %v3542_v54 }
 0x18c   : > { %v942_v12 = vmul.f32 0.2, %v788_v5 }
 0x18e   : > { %v1006_v57 = vmax.f32 %v788_v5, %v942_v12  ;;  %v2254_v5 = vld [vmem:[%s3456_s3 + $0x74] sm:$0xf0]  ;;  %v3554_v12 = vld [vmem:[#allocation10_spill] sm:$0xff] }
 0x191   : > { %v789_v52 = vpop.f32.mrf.mxu0 }
 0x192   : > { %v790_v13 = vadd.f32 %v789_v52, %v3541_v56  ;;  %v878_v46 = vpop.f32.mrf.mxu1  ;;  %v3550_v52 = vld [vmem:[#allocation15_spill] sm:$0xff] }
 0x193   : > { %v778_v44 = vadd.f32 %v777_v15, %v3550_v52  ;;  %v2214_v15 = vld [vmem:[%s3456_s3 + $0x70] sm:$0xf]  ;;  %v879_v53 = vadd.f32 %v878_v46, %v3541_v56 }
 0x194   : > { %v944_v27 = vmul.f32 0.2, %v790_v13 }
 0x196   : > { %v1008_v33 = vmax.f32 %v790_v13, %v944_v27  ;;  %v3553_v13 = vld [vmem:[#allocation3_spill] sm:$0xff] }
 0x197   : > { %1705 = vperm.xlu2 %2287, %v3553_v13  }
 0x198   : > { %v1042_v35 = vpack.c.bf16 %v1008_v33, %v1006_v57  ;;  %v3018_v33 = vpop.permute.xlu1 %1090 }
 0x199   : > { %v792_v0 = vpop.f32.mrf.mxu0  ;;  %1271 = vmatmul.bf16.gmra.mxu2 %v2972_v63  ;;  %3557 = vst [vmem:[#allocation12_spill] sm:$0xff] %v3018_v33 }
 0x19a   : > { %v793_v6 = vadd.f32 %v792_v0, %v2773_v11  ;;  %v936_v0 = vmul.f32 0.2, %v780_v17  ;;  %v881_v45 = vpop.f32.mrf.mxu1 }
 0x19c   : > { %v946_v62 = vmul.f32 0.2, %v793_v6  ;;  %v1000_v31 = vmax.f32 %v780_v17, %v936_v0  ;;  %v3014_v17 = vpop.permute.xlu2 %1080  ;;  %v2320_v0 = vmov 2  }
 0x19d   : > { %3556 = vst [vmem:[#allocation13_spill] sm:$0xff] %v3014_v17 }
 0x19e   : > { %v1010_v30 = vmax.f32 %v793_v6, %v946_v62  ;;  %v3551_v6 = vld [vmem:[#allocation9_spill] sm:$0xff]  ;;  %v3552_v62 = vld [vmem:[#allocation6_spill] sm:$0xff] }
 0x19f   : > { %1701 = vperm.xlu1 %2286, %v3551_v6   ;;  %1721 = vperm.xlu0 %2288, %v3552_v62  }
 0x1a0   : > { %v3044_v46 = vpop.permute.xlu1 %1105 }
 0x1a1   : > { %v794_v25 = vpop.f32.mrf.mxu0 }
 0x1a2   : > { %v795_v43 = vadd.f32 %v794_v25, %v3543_v18  ;;  %v1004_v25 = vmax.f32 %v785_v9, %v940_v36  ;;  %v883_v16 = vpop.f32.mrf.mxu1 }
 0x1a3   : > { %v884_v36 = vadd.f32 %v883_v16, %v3543_v18  ;;  %v877_v18 = vadd.f32 %v2975_v26, %v3542_v54  ;;  %v2160_v26 = vld [vmem:[%s3456_s3 + $0x8] sm:$0xf0]  ;;  %v2241_v16 = vld [vmem:[%s3456_s3 + $0x14] sm:$0xf] }
 0x1a4   : > { %v948_v51 = vmul.f32 0.2, %v795_v43  ;;  %v1040_v27 = vpack.c.bf16 %v1004_v25, %v1002_v28 }
 0x1a5   : > { %v949_v57 = vmul.f32 0.2, %v884_v36  ;;  %v943_v56 = vmul.f32 0.2, %v877_v18 }
 0x1a6   : > { %v1012_v61 = vmax.f32 %v795_v43, %v948_v51  ;;  %v934_v43 = vmul.f32 0.2, %v778_v44 }
 0x1a7   : > { %1713 = vperm.xlu1 %2286, %v3554_v12   ;;  %2289 = vset.pattern.permute.xlu0 %v2320_v0 }
 0x1a8   : > { %v1044_v24 = vpack.c.bf16 %v1012_v61, %v1010_v30  ;;  %v998_v51 = vmax.f32 %v778_v44, %v934_v43  ;;  %v3011_v30 = vor.u32 %v2254_v5, %v2214_v15  ;;  %v3555_v61 = vld [vmem:[#allocation5_spill] sm:$0xff]  ;;  %v3558_v44 = vld [vmem:[#allocation11_spill] sm:$0xff]  ;;  %1807 = vperm.xlu0 %2289, %v2598_v38   ;;  %v3031_v43 = vpop.permute.xlu2 %1095  ;;  %v872_v38 = vadd.f32 %v2957_v40, %v3547_v32 }
 0x1a9   : > { %1276 = vmatmul.bf16.gmra.mxu2 %v2994_v2  ;;  %1717 = vperm.xlu2 %2287, %v3555_v61   ;;  %v867_v40 = vadd.f32 %v2938_v1, %v3550_v52 }
 0x1aa   : > { %1287 = vmatpush.bf16.msra.mxu3 %v1044_v24  ;;  %v1038_v9 = vpack.c.bf16 %v1000_v31, %v998_v51  ;;  %v882_v24 = vadd.f32 %v881_v45, %v2773_v11  ;;  %v874_v11 = vadd.f32 %v2962_v20, %v3544_v4  ;;  %v1013_v45 = vmax.f32 %v884_v36, %v949_v57  ;;  %v3042_v20 = vpop.permute.xlu0 %1085  ;;  %v2168_v36 = vld [vmem:[%s3456_s3 + $0x18] sm:$0xf0] }
 0x1ab   : > { %3560 = vst [vmem:[#allocation16_spill] sm:$0xff] %v3042_v20  ;;  %v939_v32 = vmul.f32 0.2, %v872_v38  ;;  %v1007_v51 = vmax.f32 %v877_v18, %v943_v56  ;;  %v935_v15 = vmul.f32 0.2, %v867_v40 }
 0x1ac   : > { %v947_v25 = vmul.f32 0.2, %v882_v24  ;;  %v941_v4 = vmul.f32 0.2, %v874_v11 }
 0x1ae   : > { %1288 = vmatpush.bf16.msra.mxu3 %v1042_v35  ;;  %v3559_v35 = vld [vmem:[#allocation7_spill] sm:$0xff]  ;;  %v1011_v54 = vmax.f32 %v882_v24, %v947_v25 }
 0x1af   : > { %1725 = vperm.xlu1 %2286, %v3558_v44  }
 0x1b0   : > { %v1045_v31 = vpack.c.bf16 %v1013_v45, %v1011_v54  ;;  %1827 = vperm.xlu0 %2289, %v3545_v7   ;;  %v3058_v5 = vpop.permute.xlu2 %1110  ;;  %v999_v7 = vmax.f32 %v867_v40, %v935_v15  ;;  %v2192_v45 = vld [vmem:[%s3456_s3 + $0x48] sm:$0xf0] }
 0x1b1   : > { %1729 = vperm.xlu2 %2287, %v3559_v35   ;;  %v2208_v15 = vld [vmem:[%s3456_s3 + $0x68] sm:$0xf0] }
 0x1b2   : > { %1289 = vmatpush.bf16.msra.mxu3 %v1040_v27 }
 0x1b6   : > { %1290 = vmatpush.bf16.msra.mxu3 %v1038_v9  ;;  %v3061_v9 = vpop.permute.xlu0 %1100 }
 0x1b7   : > { %2290 = vset.pattern.permute.xlu1 %v2320_v0 }
 0x1b8   : > { %1811 = vperm.xlu1 %2290, %v2614_v49   ;;  %1839 = vperm.xlu0 %2289, %v3551_v6   ;;  %v3076_v24 = vpop.permute.xlu2 %1125 }
 0x1b9   : > { %1281 = vmatmul.bf16.gmra.mxu2 %v3011_v30  ;;  %2291 = vset.pattern.permute.xlu2 %v2320_v0 }
 0x1ba   : > { %1291 = vmatpush.bf16.msra.mxu3 %v2933_v48  ;;  %v945_v48 = vmul.f32 0.2, %v879_v53  ;;  %1815 = vperm.xlu2 %2291, %v2686_v23   ;;  %v3063_v23 = vpop.permute.xlu1 %1120 }
 0x1bc   : > { %v1009_v28 = vmax.f32 %v879_v53, %v945_v48  ;;  %v2247_v48 = vld [vmem:[%s3456_s3 + $0x44] sm:$0xf] }
 0x1be   : > { %1292 = vmatpush.bf16.msra.mxu3 %v2913_v21  ;;  %v2239_v21 = vld [vmem:[%s3456_s3 + $0x4] sm:$0xf]  ;;  %v1043_v49 = vpack.c.bf16 %v1009_v28, %v1007_v51  ;;  %v2200_v28 = vld [vmem:[%s3456_s3 + $0x58] sm:$0xf0] }
 0x1bf   : > { %v3048_v27 = vor.u32 %v2239_v21, %v2160_v26  ;;  %v3148_v21 = vor.u32 %v2247_v48, %v2192_v45 }
 0x1c0   : > { %1819 = vperm.xlu1 %2290, %v2619_v50   ;;  %v3073_v50 = vor.u32 %v2241_v16, %v2168_v36  ;;  %1851 = vperm.xlu0 %2289, %v3554_v12  }
 0x1c2   : > { %1293 = vmatpush.bf16.msra.mxu3 %v2893_v19  ;;  %v869_v19 = vadd.f32 %v2949_v60, %v3549_v29  ;;  %v1005_v29 = vmax.f32 %v874_v11, %v941_v4  ;;  %1823 = vperm.xlu2 %2291, %v2633_v59   ;;  %v3079_v59 = vpop.permute.xlu0 %1115  ;;  %v3081_v6 = vpop.permute.xlu1 %1135  ;;  %v2249_v4 = vld [vmem:[%s3456_s3 + $0x54] sm:$0xf] }
 0x1c4   : > { %v937_v60 = vmul.f32 0.2, %v869_v19 }
 0x1c6   : > { %1294 = vmatpush.bf16.msra.mxu3 %v2863_v37  ;;  %v1003_v37 = vmax.f32 %v872_v38, %v939_v32  ;;  %v1001_v1 = vmax.f32 %v869_v19, %v937_v60 }
 0x1c8   : > { %v1041_v52 = vpack.c.bf16 %v1005_v29, %v1003_v37  ;;  %1831 = vperm.xlu1 %2290, %v3548_v39   ;;  %v3090_v39 = vpop.permute.xlu2 %1140  ;;  %1863 = vperm.xlu0 %2289, %v3558_v44  }
 0x1c9   : > { %1295 = vmatmul.bf16.vlgmr.msra.gmra.mxu3 %v3048_v27  ;;  %1344 = vmatmul.bf16.vlgmr.msrb.gmra.mxu2 %v2887_v41  ;;  %v1039_v41 = vpack.c.bf16 %v1001_v1, %v999_v7 }
 0x1ca   : > { %1385 = vmatpush.bf16.msrb.mxu3 %v1045_v31  ;;  %1835 = vperm.xlu2 %2291, %v2655_v8   ;;  %v3096_v8 = vpop.permute.xlu1 %1150 }
 0x1cb   : > { %3561 = vst [vmem:[#allocation14_spill] sm:$0xff] %v3096_v8 }
 0x1ce   : > { %1386 = vmatpush.bf16.msrb.mxu3 %v1043_v49  ;;  %v2251_v49 = vld [vmem:[%s3456_s3 + $0x64] sm:$0xf] }
 0x1d0   : > { %1843 = vperm.xlu1 %2290, %v3553_v13   ;;  %v3112_v13 = vpop.permute.xlu2 %1155 }
 0x1d1   : > { %3563 = vst [vmem:[#allocation8_spill] sm:$0xff] %v3112_v13 }
 0x1d2   : > { %1387 = vmatpush.bf16.msrb.mxu3 %v1041_v52  ;;  %1847 = vperm.xlu2 %2291, %v3546_v34   ;;  %v3562_v34 = vmov 0   ;;  %v3116_v44 = vpop.permute.xlu1 %1521 }
 0x1d3   : > { %2293 = vset.pattern.permute.xlu0 %v3562_v34 }
 0x1d6   : > { %1388 = vmatpush.bf16.msrb.mxu3 %v1039_v41 }
 0x1d8   : > { %1855 = vperm.xlu1 %2290, %v3555_v61   ;;  %v1247_v61 = vpop.f32.mrf.mxu2 }
 0x1d9   : > { %1300 = vmatmul.bf16.gmra.mxu3 %v3073_v50  ;;  %1349 = vmatmul.bf16.gmra.mxu2 %v2910_v14  ;;  %v2243_v14 = vld [vmem:[%s3456_s3 + $0x24] sm:$0xf] }
 0x1da   : > { %1389 = vmatpush.bf16.msrb.mxu3 %v2936_v22  ;;  %v3094_v22 = vpop.permute.xlu0 %1130  ;;  %1859 = vperm.xlu2 %2291, %v3552_v62   ;;  %v2184_v62 = vld [vmem:[%s3456_s3 + $0x38] sm:$0xf0]  ;;  %v3132_v0 = vpop.permute.xlu1 %1536 }
 0x1de   : > { %1390 = vmatpush.bf16.msrb.mxu3 %v2916_v47  ;;  %v2176_v47 = vld [vmem:[%s3456_s3 + $0x28] sm:$0xf0] }
 0x1e0   : > { %1867 = vperm.xlu1 %2290, %v3559_v35   ;;  %v1249_v18 = vpop.f32.mrf.mxu2 }
 0x1e2   : > { %1391 = vmatpush.bf16.msrb.mxu3 %v2906_v42  ;;  %v3105_v42 = vor.u32 %v2243_v14, %v2176_v47  ;;  %v3114_v12 = vpop.permute.xlu0 %1145  ;;  %2292 = vset.pattern.permute.xlu2 %v3562_v34  ;;  %v3140_v11 = vpop.permute.xlu1 %1551  ;;  %v2253_v47 = vld [vmem:[%s3456_s3 + $0x74] sm:$0xf]  ;;  %v2216_v34 = vld [vmem:[%s3456_s3 + $0x78] sm:$0xf0] }
 0x1e3   : > { %3564 = vst [vmem:[#allocation4_spill] sm:$0xff] %v3114_v12 }
 0x1e6   : > { %1392 = vmatpush.bf16.msrb.mxu3 %v2908_v55  ;;  %v2245_v55 = vld [vmem:[%s3456_s3 + $0x34] sm:$0xf] }
 0x1e7   : > { %v3128_v53 = vor.u32 %v2245_v55, %v2184_v62  ;;  %v3216_v55 = vor.u32 %v2253_v47, %v2216_v34 }
 0x1e8   : > { %v1252_v26 = vpop.f32.mrf.mxu2 }
 0x1e9   : > { %1305 = vmatmul.bf16.gmra.mxu3 %v3105_v42  ;;  %1354 = vmatmul.bf16.gmra.mxu2 %v2931_v3  ;;  %v3126_v3 = vpop.permute.xlu2 %1526  ;;  %3574 = vst [vmem:[#allocation11_spill] sm:$0xff] %v3216_v55 }
 0x1ea   : > { %v3130_v57 = vpop.permute.xlu0 %1516  ;;  %v3156_v56 = vpop.permute.xlu1 %1566 }
 0x1eb   : > { %3565 = vst [vmem:[#allocation17_spill] sm:$0xff] %v3156_v56 }
 0x1f0   : > { %v3158_v54 = vpop.f32.mrf.mxu2 }
 0x1f1   : > { %v3136_v25 = vpop.permute.xlu2 %1541 }
 0x1f2   : > { %v3138_v35 = vpop.permute.xlu0 %1531  ;;  %v3170_v40 = vpop.permute.xlu1 %1581 }
 0x1f3   : > { %3567 = vst [vmem:[#allocation18_spill] sm:$0xff] %v3170_v40  ;;  %v1250_v40 = vadd.f32 %v1249_v18, %v3042_v20 }
 0x1f8   : > { %v3176_v32 = vpop.f32.mrf.mxu2 }
 0x1f9   : > { %1310 = vmatmul.bf16.gmra.mxu3 %v3128_v53  ;;  %1359 = vmatmul.bf16.gmra.mxu2 %v2946_v58  ;;  %v3150_v38 = vpop.permute.xlu2 %1556 }
 0x1fa   : > { %v3154_v58 = vpop.permute.xlu0 %1546  ;;  %v3180_v60 = vpop.permute.xlu1 %1669 }
 0x1fb   : > { %3569 = vst [vmem:[#allocation9_spill] sm:$0xff] %v3180_v60 }
 0x200   : > { %v3192_v1 = vpop.f32.mrf.mxu2 }
 0x201   : > { %v3160_v19 = vpop.permute.xlu2 %1571 }
 0x202   : > { %3566 = vst [vmem:[#allocation2_spill] sm:$0xff] %v3160_v19  ;;  %v3168_v31 = vpop.permute.xlu0 %1561  ;;  %v3196_v52 = vpop.permute.xlu1 %1681 }
 0x208   : > { %v3204_v16 = vpop.f32.mrf.mxu2 }
 0x209   : > { %1315 = vmatmul.bf16.gmra.mxu3 %v3148_v21  ;;  %1364 = vmatmul.bf16.gmra.mxu2 %v2959_v10  ;;  %v3172_v10 = vor.u32 %v2249_v4, %v2200_v28  ;;  %v3178_v51 = vpop.permute.xlu2 %1586 }
 0x20a   : > { %3568 = vst [vmem:[#allocation15_spill] sm:$0xff] %v3178_v51  ;;  %v3182_v29 = vpop.permute.xlu0 %1576  ;;  %v3208_v14 = vpop.permute.xlu1 %1689 }
 0x20b   : > { %3570 = vst [vmem:[#allocation6_spill] sm:$0xff] %v3182_v29 }
 0x211   : > { %v3190_v37 = vpop.permute.xlu2 %1673 }
 0x212   : > { %3571 = vst [vmem:[#allocation3_spill] sm:$0xff] %v3190_v37  ;;  %v3198_v7 = vpop.permute.xlu0 %1591  ;;  %v3226_v45 = vpop.permute.xlu1 %1701 }
 0x213   : > { %3572 = vst [vmem:[#allocation10_spill] sm:$0xff] %v3198_v7 }
 0x219   : > { %1320 = vmatmul.bf16.gmra.mxu3 %v3172_v10  ;;  %1369 = vmatmul.bf16.gmra.mxu2 %v2972_v63  ;;  %v3194_v63 = vor.u32 %v2251_v49, %v2208_v15  ;;  %v3202_v41 = vpop.permute.xlu2 %1685  ;;  %v1248_v15 = vadd.f32 %v1247_v61, %v3014_v17 }
 0x21a   : > { %v3206_v36 = vpop.permute.xlu0 %1677  ;;  %v3232_v49 = vpop.permute.xlu1 %1713 }
 0x21b   : > { %3573 = vst [vmem:[#allocation5_spill] sm:$0xff] %v3206_v36 }
 0x21c   : > { %3578 = vst [vmem:[#allocation21_spill] sm:$0xff] %v3232_v49 }
 0x221   : > { %v3218_v62 = vpop.permute.xlu2 %1693 }
 0x222   : > { %v3224_v48 = vpop.permute.xlu0 %1697 }
 0x223   : > { %3575 = vst [vmem:[#allocation7_spill] sm:$0xff] %v3224_v48 }
 0x229   : > { %1325 = vmatmul.bf16.gmra.mxu3 %v3194_v63  ;;  %1374 = vmatmul.bf16.gmra.mxu2 %v2994_v2  ;;  %v3220_v2 = vpop.f32.mrf.mxu2  ;;  %v3228_v4 = vpop.permute.xlu2 %1705 }
 0x22a   : > { %3576 = vst [vmem:[#allocation19_spill] sm:$0xff] %v3228_v4  ;;  %v3230_v28 = vpop.permute.xlu0 %1709 }
 0x22b   : > { %3577 = vst [vmem:[#allocation20_spill] sm:$0xff] %v3230_v28 }
 0x231   : > { %v3236_v34 = vpop.permute.xlu2 %1717 }
 0x232   : > { %3579 = vst [vmem:[#allocation22_spill] sm:$0xff] %v3236_v34  ;;  %v3238_v51 = vpop.permute.xlu0 %1721 }
 0x233   : > { %3580 = vst [vmem:[#allocation23_spill] sm:$0xff] %v3238_v51 }
 0x239   : > { %1330 = vmatmul.bf16.gmra.mxu3 %v3216_v55  ;;  %1379 = vmatmul.bf16.gmra.mxu2 %v3011_v30  ;;  %v3240_v30 = vpop.permute.xlu1 %1725  ;;  %v3243_v12 = vpop.permute.xlu2 %1729 }
 0x23a   : > { %3581 = vst [vmem:[#allocation24_spill] sm:$0xff] %v3240_v30 }
 0x23b   : > { %3582 = vst [vmem:[#allocation25_spill] sm:$0xff] %v3243_v12 }
 0x241   : > { %v3247_v61 = vpop.permute.xlu1 %1811 }
 0x249   : > { %1393 = vmatmul.bf16.vlgmr.msrb.gmra.mxu3 %v3048_v27  ;;  %v3245_v27 = vpop.permute.xlu0 %1807 }
 0x24c   : > { %v1296_v47 = vpop.f32.mrf.mxu3 }
 0x24d   : > { %v1297_v7 = vadd.f32 %v1296_v47, %v1248_v15  ;;  %v1253_v15 = vadd.f32 %v1252_v26, %v3018_v33  ;;  %v3251_v47 = vpop.f32.mrf.mxu2  ;;  %v3259_v33 = vpop.permute.xlu2 %1815 }
 0x24e   : > { %3583 = vst [vmem:[#allocation26_spill] sm:$0xff] %v3259_v33 }
 0x24f   : > { %v1434_v13 = vmul.f32 0.2, %v1297_v7 }
 0x251   : > { %v1466_v29 = vmax.f32 %v1297_v7, %v1434_v13 }
 0x253   : > { %v1594_v30 = vmul.f32 %v3130_v57, %v1466_v29  ;;  %v1732_v18 = vmul.f32 %v3180_v60, %v1466_v29  ;;  %v1950_v60 = vld [vmem:[%s3459_s6] sm:$0x7] }
 0x254   : > { %v1298_v8 = vpop.f32.mrf.mxu3  ;;  %1953 = vperm.xlu2 %2292, %v1950_v60  }
 0x255   : > { %v1299_v55 = vadd.f32 %v1298_v8, %v1250_v40  ;;  %v1870_v8 = vmul.f32 %v3245_v27, %v1466_v29  ;;  %v1255_v29 = vadd.f32 %v3158_v54, %v3031_v43  ;;  %v1258_v54 = vadd.f32 %v3176_v32, %v3061_v9 }
 0x256   : > { %v1260_v32 = vadd.f32 %v3192_v1, %v3044_v46  ;;  %v1263_v1 = vadd.f32 %v3204_v16, %v3058_v5 }
 0x257   : > { %v1436_v49 = vmul.f32 0.2, %v1299_v55 }
 0x259   : > { %v1468_v17 = vmax.f32 %v1299_v55, %v1436_v49  ;;  %1398 = vmatmul.bf16.gmra.mxu3 %v3073_v50 }
 0x25b   : > { %v1596_v13 = vmul.f32 %v3116_v44, %v1468_v17  ;;  %v1734_v40 = vmul.f32 %v3190_v37, %v1468_v17  ;;  %v1872_v7 = vmul.f32 %v3247_v61, %v1468_v17 }
 0x25c   : > { %v1301_v20 = vpop.f32.mrf.mxu3 }
 0x25d   : > { %v1626_v55 = vadd.f32 %v1596_v13, %v1594_v30  ;;  %v1764_v49 = vadd.f32 %v1734_v40, %v1732_v18  ;;  %v1902_v50 = vadd.f32 %v1872_v7, %v1870_v8  ;;  %v1302_v12 = vadd.f32 %v1301_v20, %v1253_v15  ;;  %v3269_v18 = vpop.f32.mrf.mxu2  ;;  %v3271_v7 = vpop.permute.xlu1 %1819 }
 0x25f   : > { %v1438_v26 = vmul.f32 0.2, %v1302_v12 }
 0x261   : > { %v1470_v51 = vmax.f32 %v1302_v12, %v1438_v26 }
 0x263   : > { %v1598_v37 = vmul.f32 %v3126_v3, %v1470_v51  ;;  %v1736_v17 = vmul.f32 %v3206_v36, %v1470_v51  ;;  %v1874_v30 = vmul.f32 %v3259_v33, %v1470_v51 }
 0x264   : > { %v1303_v20 = vpop.f32.mrf.mxu3 }
 0x265   : > { %v1627_v15 = vadd.f32 %v1626_v55, %v1598_v37  ;;  %v1765_v8 = vadd.f32 %v1764_v49, %v1736_v17  ;;  %v1903_v12 = vadd.f32 %v1902_v50, %v1874_v30  ;;  %v1304_v13 = vadd.f32 %v1303_v20, %v1255_v29  ;;  %v3279_v29 = vpop.f32.mrf.mxu2  ;;  %v3281_v30 = vpop.permute.xlu2 %1823 }
 0x267   : > { %v1440_v40 = vmul.f32 0.2, %v1304_v13 }
 0x269   : > { %v1472_v26 = vmax.f32 %v1304_v13, %v1440_v40  ;;  %1403 = vmatmul.bf16.gmra.mxu3 %v3105_v42 }
 0x26b   : > { %v1600_v36 = vmul.f32 %v3138_v35, %v1472_v26  ;;  %v1738_v51 = vmul.f32 %v3196_v52, %v1472_v26  ;;  %v1876_v60 = vmul.f32 %v3271_v7, %v1472_v26 }
 0x26c   : > { %v1306_v33 = vpop.f32.mrf.mxu3 }
 0x26d   : > { %v1628_v37 = vadd.f32 %v1627_v15, %v1600_v36  ;;  %v1766_v55 = vadd.f32 %v1765_v8, %v1738_v51  ;;  %v1904_v49 = vadd.f32 %v1903_v12, %v1876_v60  ;;  %v1307_v50 = vadd.f32 %v1306_v33, %v1258_v54  ;;  %v3288_v54 = vpop.f32.mrf.mxu2  ;;  %v3290_v51 = vpop.permute.xlu0 %1827 }
 0x26e   : > { %3584 = vst [vmem:[#allocation27_spill] sm:$0xff] %v3290_v51 }
 0x26f   : > { %v1442_v17 = vmul.f32 0.2, %v1307_v50 }
 0x271   : > { %v1474_v42 = vmax.f32 %v1307_v50, %v1442_v17 }
 0x273   : > { %v1602_v20 = vmul.f32 %v3132_v0, %v1474_v42  ;;  %v1740_v13 = vmul.f32 %v3202_v41, %v1474_v42  ;;  %v1878_v40 = vmul.f32 %v3281_v30, %v1474_v42 }
 0x274   : > { %v1308_v26 = vpop.f32.mrf.mxu3 }
 0x275   : > { %v1629_v36 = vadd.f32 %v1628_v37, %v1602_v20  ;;  %v1767_v15 = vadd.f32 %v1766_v55, %v1740_v13  ;;  %v1905_v8 = vadd.f32 %v1904_v49, %v1878_v40  ;;  %v1309_v33 = vadd.f32 %v1308_v26, %v1260_v32  ;;  %v3298_v40 = vpop.permute.xlu1 %1831 }
 0x277   : > { %v1444_v12 = vmul.f32 0.2, %v1309_v33 }
 0x279   : > { %v1476_v60 = vmax.f32 %v1309_v33, %v1444_v12  ;;  %1408 = vmatmul.bf16.gmra.mxu3 %v3128_v53  ;;  %v3300_v33 = vpop.f32.mrf.mxu2  ;;  %v1265_v53 = vadd.f32 %v3220_v2, %v3079_v59  ;;  %v1268_v2 = vadd.f32 %v3251_v47, %v3063_v23 }
 0x27b   : > { %v1604_v50 = vmul.f32 %v3136_v25, %v1476_v60  ;;  %v1742_v17 = vmul.f32 %v3208_v14, %v1476_v60  ;;  %v1880_v37 = vmul.f32 %v3290_v51, %v1476_v60 }
 0x27c   : > { %v1311_v55 = vpop.f32.mrf.mxu3 }
 0x27d   : > { %v1630_v49 = vadd.f32 %v1629_v36, %v1604_v50  ;;  %v1768_v42 = vadd.f32 %v1767_v15, %v1742_v17  ;;  %v1906_v32 = vadd.f32 %v1905_v8, %v1880_v37  ;;  %v1312_v20 = vadd.f32 %v1311_v55, %v1263_v1  ;;  %v3307_v17 = vpop.permute.xlu2 %1835 }
 0x27e   : > { %3585 = vst [vmem:[#allocation28_spill] sm:$0xff] %v3307_v17 }
 0x27f   : > { %v1446_v13 = vmul.f32 0.2, %v1312_v20 }
 0x281   : > { %v1478_v26 = vmax.f32 %v1312_v20, %v1446_v13 }
 0x283   : > { %v1606_v16 = vmul.f32 %v3154_v58, %v1478_v26  ;;  %v1744_v12 = vmul.f32 %v3218_v62, %v1478_v26  ;;  %v1882_v60 = vmul.f32 %v3298_v40, %v1478_v26  ;;  %v1279_v26 = vpop.f32.mrf.mxu2 }
 0x284   : > { %v1313_v51 = vpop.f32.mrf.mxu3 }
 0x285   : > { %v1631_v36 = vadd.f32 %v1630_v49, %v1606_v16  ;;  %v1769_v15 = vadd.f32 %v1768_v42, %v1744_v12  ;;  %v1907_v8 = vadd.f32 %v1906_v32, %v1882_v60  ;;  %v1314_v1 = vadd.f32 %v1313_v51, %v1265_v53  ;;  %v3315_v12 = vpop.permute.xlu0 %1839 }
 0x287   : > { %v1448_v50 = vmul.f32 0.2, %v1314_v1 }
 0x289   : > { %v1480_v37 = vmax.f32 %v1314_v1, %v1448_v50  ;;  %1413 = vmatmul.bf16.gmra.mxu3 %v3148_v21  ;;  %v1270_v21 = vadd.f32 %v3269_v18, %v3076_v24  ;;  %v1273_v18 = vadd.f32 %v3279_v29, %v3094_v22 }
 0x28b   : > { %v1608_v55 = vmul.f32 %v3140_v11, %v1480_v37  ;;  %v1746_v20 = vmul.f32 %v3224_v48, %v1480_v37  ;;  %v1884_v13 = vmul.f32 %v3307_v17, %v1480_v37 }
 0x28c   : > { %v1316_v49 = vpop.f32.mrf.mxu3 }
 0x28d   : > { %v1632_v42 = vadd.f32 %v1631_v36, %v1608_v55  ;;  %v1770_v32 = vadd.f32 %v1769_v15, %v1746_v20  ;;  %v1908_v51 = vadd.f32 %v1907_v8, %v1884_v13  ;;  %v1317_v53 = vadd.f32 %v1316_v49, %v1268_v2  ;;  %v1282_v8 = vpop.f32.mrf.mxu2  ;;  %v3322_v55 = vpop.permute.xlu1 %1843 }
 0x28e   : > { %3586 = vst [vmem:[#allocation29_spill] sm:$0xff] %v3322_v55 }
 0x28f   : > { %v1450_v16 = vmul.f32 0.2, %v1317_v53 }
 0x291   : > { %v1482_v60 = vmax.f32 %v1317_v53, %v1450_v16 }
 0x293   : > { %v1610_v47 = vmul.f32 %v3150_v38, %v1482_v60  ;;  %v1748_v1 = vmul.f32 %v3226_v45, %v1482_v60  ;;  %v1886_v50 = vmul.f32 %v3315_v12, %v1482_v60 }
 0x294   : > { %v1318_v37 = vpop.f32.mrf.mxu3 }
 0x295   : > { %v1633_v17 = vadd.f32 %v1632_v42, %v1610_v47  ;;  %v1771_v48 = vadd.f32 %v1770_v32, %v1748_v1  ;;  %v1909_v36 = vadd.f32 %v1908_v51, %v1886_v50  ;;  %v1319_v15 = vadd.f32 %v1318_v37, %v1270_v21  ;;  %v1284_v47 = vpop.f32.mrf.mxu2  ;;  %v3330_v1 = vpop.permute.xlu2 %1847 }
 0x296   : > { %3587 = vst [vmem:[#allocation30_spill] sm:$0xff] %v3330_v1 }
 0x297   : > { %v1452_v2 = vmul.f32 0.2, %v1319_v15 }
 0x299   : > { %v1484_v20 = vmax.f32 %v1319_v15, %v1452_v2  ;;  %1418 = vmatmul.bf16.gmra.mxu3 %v3172_v10  ;;  %v1275_v10 = vadd.f32 %v3288_v54, %v3081_v6  ;;  %v1278_v54 = vadd.f32 %v3300_v33, %v3090_v39 }
 0x29b   : > { %v1612_v13 = vmul.f32 %v3168_v31, %v1484_v20  ;;  %v1750_v49 = vmul.f32 %v3228_v4, %v1484_v20  ;;  %v1888_v53 = vmul.f32 %v3322_v55, %v1484_v20 }
 0x29c   : > { %v1321_v42 = vpop.f32.mrf.mxu3 }
 0x29d   : > { %v1634_v32 = vadd.f32 %v1633_v17, %v1612_v13  ;;  %v1772_v51 = vadd.f32 %v1771_v48, %v1750_v49  ;;  %v1910_v16 = vadd.f32 %v1909_v36, %v1888_v53  ;;  %v1322_v60 = vadd.f32 %v1321_v42, %v1273_v18  ;;  %v3337_v13 = vpop.permute.xlu0 %1851  ;;  %v1345_v53 = vpop.f32.mrf.mxu2 }
 0x29e   : > { %3588 = vst [vmem:[#allocation31_spill] sm:$0xff] %v3337_v13 }
 0x29f   : > { %v1454_v21 = vmul.f32 0.2, %v1322_v60 }
 0x2a1   : > { %v1486_v50 = vmax.f32 %v1322_v60, %v1454_v21  ;;  %v3589_v60 = vld [vmem:[#allocation21_spill] sm:$0xff] }
 0x2a3   : > { %v1614_v29 = vmul.f32 %v3156_v56, %v1486_v50  ;;  %v1752_v37 = vmul.f32 %v3230_v28, %v1486_v50  ;;  %v1890_v15 = vmul.f32 %v3330_v1, %v1486_v50 }
 0x2a4   : > { %v1323_v2 = vpop.f32.mrf.mxu3 }
 0x2a5   : > { %v1635_v20 = vadd.f32 %v1634_v32, %v1614_v29  ;;  %v1773_v17 = vadd.f32 %v1772_v51, %v1752_v37  ;;  %v1911_v48 = vadd.f32 %v1910_v16, %v1890_v15  ;;  %v1324_v36 = vadd.f32 %v1323_v2, %v1275_v10  ;;  %v3345_v15 = vpop.permute.xlu1 %1855 }
 0x2a6   : > { %3590 = vst [vmem:[#allocation32_spill] sm:$0xff] %v3345_v15 }
 0x2a7   : > { %v1456_v18 = vmul.f32 0.2, %v1324_v36 }
 0x2a9   : > { %v1488_v49 = vmax.f32 %v1324_v36, %v1456_v18  ;;  %1423 = vmatmul.bf16.gmra.mxu3 %v3194_v63  ;;  %v3591_v63 = vld [vmem:[#allocation4_spill] sm:$0xff]  ;;  %v3592_v18 = vld [vmem:[#allocation6_spill] sm:$0xff] }
 0x2aa   : > { %v1280_v36 = vadd.f32 %v1279_v26, %v3591_v63 }
 0x2ab   : > { %v1616_v42 = vmul.f32 %v3160_v19, %v1488_v49  ;;  %v1754_v21 = vmul.f32 %v3589_v60, %v1488_v49  ;;  %v1892_v50 = vmul.f32 %v3337_v13, %v1488_v49  ;;  %v1347_v60 = vpop.f32.mrf.mxu2 }
 0x2ac   : > { %v1326_v32 = vpop.f32.mrf.mxu3 }
 0x2ad   : > { %v1636_v51 = vadd.f32 %v1635_v20, %v1616_v42  ;;  %v1774_v16 = vadd.f32 %v1773_v17, %v1754_v21  ;;  %v1912_v10 = vadd.f32 %v1911_v48, %v1892_v50  ;;  %v1327_v29 = vadd.f32 %v1326_v32, %v1278_v54  ;;  %v3351_v54 = vpop.permute.xlu2 %1859  ;;  %v3594_v21 = vld [vmem:[#allocation11_spill] sm:$0xff]  ;;  %v3595_v50 = vld [vmem:[#allocation14_spill] sm:$0xff] }
 0x2ae   : > { %3593 = vst [vmem:[#allocation4_spill] sm:$0xff] %v3351_v54  ;;  %v1283_v26 = vadd.f32 %v1282_v8, %v3595_v50  ;;  %v3596_v32 = vld [vmem:[#allocation18_spill] sm:$0xff] }
 0x2af   : > { %v1458_v37 = vmul.f32 0.2, %v1327_v29 }
 0x2b1   : > { %v1490_v2 = vmax.f32 %v1327_v29, %v1458_v37  ;;  %v3597_v37 = vld [vmem:[#allocation23_spill] sm:$0xff] }
 0x2b3   : > { %v1618_v1 = vmul.f32 %v3592_v18, %v1490_v2  ;;  %v1756_v33 = vmul.f32 %v3236_v34, %v1490_v2  ;;  %v1894_v19 = vmul.f32 %v3345_v15, %v1490_v2 }
 0x2b4   : > { %v1328_v28 = vpop.f32.mrf.mxu3 }
 0x2b5   : > { %v1637_v49 = vadd.f32 %v1636_v51, %v1618_v1  ;;  %v1775_v13 = vadd.f32 %v1774_v16, %v1756_v33  ;;  %v1913_v20 = vadd.f32 %v1912_v10, %v1894_v19  ;;  %v1329_v17 = vadd.f32 %v1328_v28, %v1280_v36  ;;  %v1350_v28 = vpop.f32.mrf.mxu2  ;;  %v3358_v10 = vpop.permute.xlu0 %1863  ;;  %v3599_v33 = vld [vmem:[#allocation8_spill] sm:$0xff] }
 0x2b6   : > { %3598 = vst [vmem:[#allocation11_spill] sm:$0xff] %v3358_v10 }
 0x2b7   : > { %v1460_v48 = vmul.f32 0.2, %v1329_v17 }
 0x2b9   : > { %v1492_v42 = vmax.f32 %v1329_v17, %v1460_v48  ;;  %1428 = vmatmul.bf16.gmra.mxu3 %v3594_v21  ;;  %v1285_v17 = vadd.f32 %v1284_v47, %v3599_v33  ;;  %v3600_v48 = vld [vmem:[#allocation15_spill] sm:$0xff]  ;;  %v3601_v21 = vld [vmem:[#allocation24_spill] sm:$0xff] }
 0x2bb   : > { %v1620_v29 = vmul.f32 %v3596_v32, %v1492_v42  ;;  %v1758_v34 = vmul.f32 %v3597_v37, %v1492_v42  ;;  %v1896_v2 = vmul.f32 %v3351_v54, %v1492_v42 }
 0x2bc   : > { %v1331_v15 = vpop.f32.mrf.mxu3 }
 0x2bd   : > { %v1638_v18 = vadd.f32 %v1637_v49, %v1620_v29  ;;  %v1776_v1 = vadd.f32 %v1775_v13, %v1758_v34  ;;  %v1914_v51 = vadd.f32 %v1913_v20, %v1896_v2  ;;  %v1332_v19 = vadd.f32 %v1331_v15, %v1283_v26  ;;  %v1352_v15 = vpop.f32.mrf.mxu2  ;;  %v3364_v20 = vpop.permute.xlu1 %1867  ;;  %v3603_v29 = vld [vmem:[#allocation13_spill] sm:$0xff] }
 0x2be   : > { %3602 = vst [vmem:[#allocation14_spill] sm:$0xff] %v3364_v20  ;;  %v1346_v2 = vadd.f32 %v1345_v53, %v3603_v29  ;;  %v3606_v53 = vld [vmem:[#allocation16_spill] sm:$0xff] }
 0x2bf   : > { %v1462_v16 = vmul.f32 0.2, %v1332_v19  ;;  %v1348_v29 = vadd.f32 %v1347_v60, %v3606_v53  ;;  %v3607_v60 = vld [vmem:[#allocation9_spill] sm:$0xff] }
 0x2c1   : > { %v1494_v36 = vmax.f32 %v1332_v19, %v1462_v16  ;;  %v3604_v19 = vld [vmem:[#allocation10_spill] sm:$0xff]  ;;  %v3605_v16 = vld [vmem:[#allocation25_spill] sm:$0xff] }
 0x2c3   : > { %v1622_v8 = vmul.f32 %v3600_v48, %v1494_v36  ;;  %v1760_v32 = vmul.f32 %v3601_v21, %v1494_v36  ;;  %v1898_v37 = vmul.f32 %v3358_v10, %v1494_v36 }
 0x2c4   : > { %v1333_v56 = vpop.f32.mrf.mxu3 }
 0x2c5   : > { %v1639_v42 = vadd.f32 %v1638_v18, %v1622_v8  ;;  %v1777_v54 = vadd.f32 %v1776_v1, %v1760_v32  ;;  %v1915_v49 = vadd.f32 %v1914_v51, %v1898_v37  ;;  %v1334_v34 = vadd.f32 %v1333_v56, %v1285_v17 }
 0x2c7   : > { %v1464_v13 = vmul.f32 0.2, %v1334_v34 }
 0x2c9   : > { %v1496_v26 = vmax.f32 %v1334_v34, %v1464_v13  ;;  %v1355_v34 = vpop.f32.mrf.mxu2 }
 0x2cb   : > { %v1624_v47 = vmul.f32 %v3604_v19, %v1496_v26  ;;  %v1762_v48 = vmul.f32 %v3605_v16, %v1496_v26  ;;  %v1900_v21 = vmul.f32 %v3364_v20, %v1496_v26 }
 0x2cc   : > { %v1394_v33 = vpop.f32.mrf.mxu3 }
 0x2cd   : > { %v1640_v36 = vadd.f32 %v1639_v42, %v1624_v47  ;;  %v1778_v10 = vadd.f32 %v1777_v54, %v1762_v48  ;;  %v1916_v18 = vadd.f32 %v1915_v49, %v1900_v21  ;;  %v1395_v32 = vadd.f32 %v1394_v33, %v1346_v2 }
 0x2cf   : > { %v1641_v37 = vrot.slane %v1640_v36, 4  ;;  %v1779_v56 = vrot.slane %v1778_v10, 4  ;;  %v1917_v1 = vrot.slane %v1916_v18, 4  ;;  %v1435_v13 = vmul.f32 0.2, %v1395_v32 }
 0x2d1   : > { %v1642_v51 = vadd.f32 %v1641_v37, %v1640_v36  ;;  %v1780_v17 = vadd.f32 %v1779_v56, %v1778_v10  ;;  %v1918_v8 = vadd.f32 %v1917_v1, %v1916_v18  ;;  %v1467_v42 = vmax.f32 %v1395_v32, %v1435_v13  ;;  %v3609_v1 = vld [vmem:[#allocation12_spill] sm:$0xff] }
 0x2d3   : > { %v1919_v19 = vrot.slane %v1918_v8, 2  ;;  %v1643_v16 = vrot.slane %v1642_v51, 2  ;;  %v1781_v4 = vrot.slane %v1780_v17, 2  ;;  %v1595_v36 = vmul.f32 %v3130_v57, %v1467_v42 }
 0x2d4   : > { %v1396_v55 = vpop.f32.mrf.mxu3  ;;  %v1733_v18 = vmul.f32 %v3607_v60, %v1467_v42 }
 0x2d5   : > { %v1920_v26 = vadd.f32 %v1919_v19, %v1918_v8  ;;  %v1397_v20 = vadd.f32 %v1396_v55, %v1348_v29  ;;  %v1644_v54 = vadd.f32 %v1643_v16, %v1642_v51  ;;  %v1782_v48 = vadd.f32 %v1781_v4, %v1780_v17  ;;  %v3608_v16 = vld [vmem:[#allocation3_spill] sm:$0xff] }
 0x2d6   : > { %v1871_v19 = vmul.f32 %v3245_v27, %v1467_v42  ;;  %v1351_v51 = vadd.f32 %v1350_v28, %v3609_v1  ;;  %v3611_v28 = vld [vmem:[#allocation26_spill] sm:$0xff] }
 0x2d7   : > { %v1437_v33 = vmul.f32 0.2, %v1397_v20  ;;  %v1921_v21 = vrot.slane %v1920_v26, 1  ;;  %v1645_v49 = vrot.slane %v1644_v54, 1  ;;  %v1783_v2 = vrot.slane %v1782_v48, 1 }
 0x2d9   : > { %v1469_v47 = vmax.f32 %v1397_v20, %v1437_v33  ;;  %v1922_v10 = vadd.f32 %v1921_v21, %v1920_v26  ;;  %v1646_v37 = vadd.f32 %v1645_v49, %v1644_v54  ;;  %v1784_v56 = vadd.f32 %v1783_v2, %v1782_v48  ;;  %v1357_v20 = vpop.f32.mrf.mxu2 }
 0x2db   : > { %v1597_v55 = vmul.f32 %v3116_v44, %v1469_v47  ;;  %v1735_v4 = vmul.f32 %v3608_v16, %v1469_v47  ;;  %v1873_v32 = vmul.f32 %v3247_v61, %v1469_v47  ;;  %v1945_v17 = vsel %vm1944_vm1, %v1646_v37, %v1784_v56  ;;  %v3610_v61 = vld [vmem:[#allocation5_spill] sm:$0xff] }
 0x2dc   : > { %v1399_v8 = vpop.f32.mrf.mxu3  ;;  %v3380_v29 = vsel %vm1947_vm2, %v1945_v17, %v1922_v10  ;;  %v1353_v44 = vadd.f32 %v1352_v15, %v3031_v43  ;;  %v1356_v37 = vadd.f32 %v1355_v34, %v3061_v9 }
 0x2dd   : > { %v1647_v13 = vadd.f32 %v1597_v55, %v1595_v36  ;;  %v1785_v57 = vadd.f32 %v1735_v4, %v1733_v18  ;;  %v1923_v53 = vadd.f32 %v1873_v32, %v1871_v19  ;;  %v1400_v26 = vadd.f32 %v1399_v8, %v1351_v51 }
 0x2df   : > { %v1439_v27 = vmul.f32 0.2, %v1400_v26 }
 0x2e1   : > { %v1471_v42 = vmax.f32 %v1400_v26, %v1439_v27  ;;  %v1360_v2 = vpop.f32.mrf.mxu2 }
 0x2e3   : > { %v1599_v54 = vmul.f32 %v3126_v3, %v1471_v42  ;;  %v1737_v48 = vmul.f32 %v3610_v61, %v1471_v42  ;;  %v1875_v33 = vmul.f32 %v3611_v28, %v1471_v42 }
 0x2e4   : > { %v1401_v21 = vpop.f32.mrf.mxu3 }
 0x2e5   : > { %v1402_v49 = vadd.f32 %v1401_v21, %v1353_v44  ;;  %v1648_v47 = vadd.f32 %v1647_v13, %v1599_v54  ;;  %v1786_v36 = vadd.f32 %v1785_v57, %v1737_v48  ;;  %v1924_v60 = vadd.f32 %v1923_v53, %v1875_v33 }
 0x2e7   : > { %v1441_v18 = vmul.f32 0.2, %v1402_v49 }
 0x2e9   : > { %v1473_v10 = vmax.f32 %v1402_v49, %v1441_v18  ;;  %v1362_v1 = vpop.f32.mrf.mxu2 }
 0x2ea   : > { %v1363_v33 = vadd.f32 %v1362_v1, %v3079_v59 }
 0x2eb   : > { %v1601_v56 = vmul.f32 %v3138_v35, %v1473_v10  ;;  %v1739_v43 = vmul.f32 %v3196_v52, %v1473_v10  ;;  %v1877_v3 = vmul.f32 %v3271_v7, %v1473_v10 }
 0x2ec   : > { %v1404_v15 = vpop.f32.mrf.mxu3 }
 0x2ed   : > { %v1649_v19 = vadd.f32 %v1648_v47, %v1601_v56  ;;  %v1787_v55 = vadd.f32 %v1786_v36, %v1739_v43  ;;  %v1925_v16 = vadd.f32 %v1924_v60, %v1877_v3  ;;  %v1405_v4 = vadd.f32 %v1404_v15, %v1356_v37 }
 0x2ef   : > { %v1443_v32 = vmul.f32 0.2, %v1405_v4 }
 0x2f1   : > { %v1475_v51 = vmax.f32 %v1405_v4, %v1443_v32  ;;  %v1365_v57 = vpop.f32.mrf.mxu2  ;;  %v3612_v4 = vld [vmem:[#allocation27_spill] sm:$0xff] }
 0x2f2   : > { %v1366_v47 = vadd.f32 %v1365_v57, %v3063_v23 }
 0x2f3   : > { %v1603_v17 = vmul.f32 %v3132_v0, %v1475_v51  ;;  %v1741_v8 = vmul.f32 %v3202_v41, %v1475_v51  ;;  %v1879_v9 = vmul.f32 %v3281_v30, %v1475_v51  ;;  %v1358_v0 = vadd.f32 %v1357_v20, %v3044_v46 }
 0x2f4   : > { %v1406_v34 = vpop.f32.mrf.mxu3  ;;  %v1361_v30 = vadd.f32 %v1360_v2, %v3058_v5 }
 0x2f5   : > { %v1650_v35 = vadd.f32 %v1649_v19, %v1603_v17  ;;  %v1788_v13 = vadd.f32 %v1787_v55, %v1741_v8  ;;  %v1926_v52 = vadd.f32 %v1925_v16, %v1879_v9  ;;  %v1407_v41 = vadd.f32 %v1406_v34, %v1358_v0 }
 0x2f7   : > { %v1445_v49 = vmul.f32 0.2, %v1407_v41 }
 0x2f9   : > { %v1367_v53 = vpop.f32.mrf.mxu2  ;;  %v1477_v43 = vmax.f32 %v1407_v41, %v1445_v49 }
 0x2fa   : > { %v1368_v10 = vadd.f32 %v1367_v53, %v3076_v24  ;;  %v3613_v53 = vld [vmem:[#allocation7_spill] sm:$0xff] }
 0x2fb   : > { %v1605_v19 = vmul.f32 %v3136_v25, %v1477_v43  ;;  %v1743_v23 = vmul.f32 %v3208_v14, %v1477_v43  ;;  %v1881_v32 = vmul.f32 %v3612_v4, %v1477_v43  ;;  %v3618_v43 = vld [vmem:[#allocation20_spill] sm:$0xff] }
 0x2fc   : > { %v1409_v7 = vpop.f32.mrf.mxu3 }
 0x2fd   : > { %v1410_v21 = vadd.f32 %v1409_v7, %v1361_v30  ;;  %v1651_v25 = vadd.f32 %v1650_v35, %v1605_v19  ;;  %v1789_v7 = vadd.f32 %v1788_v13, %v1743_v23  ;;  %v3620_v19 = vld [vmem:[#allocation2_spill] sm:$0xff] }
 0x2ff   : > { %v1447_v37 = vmul.f32 0.2, %v1410_v21 }
 0x301   : > { %v1370_v42 = vpop.f32.mrf.mxu2  ;;  %v1479_v15 = vmax.f32 %v1410_v21, %v1447_v37  ;;  %v3615_v21 = vld [vmem:[#allocation19_spill] sm:$0xff] }
 0x302   : > { %v1371_v46 = vadd.f32 %v1370_v42, %v3094_v22  ;;  %v1927_v42 = vadd.f32 %v1926_v52, %v1881_v32 }
 0x303   : > { %v1607_v22 = vmul.f32 %v3154_v58, %v1479_v15  ;;  %v1745_v17 = vmul.f32 %v3218_v62, %v1479_v15  ;;  %v1883_v14 = vmul.f32 %v3298_v40, %v1479_v15  ;;  %v3619_v15 = vld [vmem:[#allocation30_spill] sm:$0xff] }
 0x304   : > { %v1411_v26 = vpop.f32.mrf.mxu3 }
 0x305   : > { %v1412_v36 = vadd.f32 %v1411_v26, %v1363_v33  ;;  %v1928_v40 = vadd.f32 %v1927_v42, %v1883_v14 }
 0x307   : > { %v1449_v20 = vmul.f32 0.2, %v1412_v36 }
 0x309   : > { %v1372_v54 = vpop.f32.mrf.mxu2  ;;  %v1481_v55 = vmax.f32 %v1412_v36, %v1449_v20 }
 0x30a   : > { %v1373_v59 = vadd.f32 %v1372_v54, %v3081_v6 }
 0x30b   : > { %v1747_v26 = vmul.f32 %v3613_v53, %v1481_v55 }
 0x30c   : > { %v1414_v27 = vpop.f32.mrf.mxu3 }
 0x30d   : > { %v1415_v56 = vadd.f32 %v1414_v27, %v1366_v47 }
 0x30f   : > { %v1451_v5 = vmul.f32 0.2, %v1415_v56 }
 0x311   : > { %v1375_v48 = vpop.f32.mrf.mxu2  ;;  %v1483_v8 = vmax.f32 %v1415_v56, %v1451_v5 }
 0x312   : > { %v1376_v24 = vadd.f32 %v1375_v48, %v3090_v39  ;;  %v1609_v39 = vmul.f32 %v3140_v11, %v1481_v55  ;;  %v1790_v48 = vadd.f32 %v1789_v7, %v1745_v17  ;;  %v3623_v17 = vld [vmem:[#allocation6_spill] sm:$0xff]  ;;  %v3626_v7 = vld [vmem:[#allocation32_spill] sm:$0xff] }
 0x313   : > { %v1749_v13 = vmul.f32 %v3226_v45, %v1483_v8  ;;  %v1887_v30 = vmul.f32 %v3315_v12, %v1483_v8 }
 0x314   : > { %v1416_v44 = vpop.f32.mrf.mxu3  ;;  %v1791_v41 = vadd.f32 %v1790_v48, %v1747_v26 }
 0x315   : > { %v1417_v3 = vadd.f32 %v1416_v44, %v1368_v10  ;;  %v3614_v44 = vld [vmem:[#allocation28_spill] sm:$0xff] }
 0x316   : > { %v1885_v58 = vmul.f32 %v3614_v44, %v1481_v55  ;;  %v1792_v45 = vadd.f32 %v1791_v41, %v1749_v13  ;;  %v3621_v55 = vld [vmem:[#allocation21_spill] sm:$0xff]  ;;  %v3628_v44 = vld [vmem:[#allocation23_spill] sm:$0xff] }
 0x317   : > { %v1453_v16 = vmul.f32 0.2, %v1417_v3 }
 0x318   : > { %v1929_v33 = vadd.f32 %v1928_v40, %v1885_v58  ;;  %v3630_v40 = vld [vmem:[#allocation15_spill] sm:$0xff] }
 0x319   : > { %v1377_v60 = vpop.f32.mrf.mxu2  ;;  %v1485_v27 = vmax.f32 %v1417_v3, %v1453_v16 }
 0x31a   : > { %v1378_v6 = vadd.f32 %v1377_v60, %v3591_v63  ;;  %v1611_v63 = vmul.f32 %v3150_v38, %v1483_v8  ;;  %v1930_v3 = vadd.f32 %v1929_v33, %v1887_v30  ;;  %v3632_v30 = vld [vmem:[#allocation11_spill] sm:$0xff] }
 0x31b   : > { %v1613_v52 = vmul.f32 %v3168_v31, %v1485_v27  ;;  %v1751_v49 = vmul.f32 %v3615_v21, %v1485_v27 }
 0x31c   : > { %v1419_v61 = vpop.f32.mrf.mxu3 }
 0x31d   : > { %v1420_v2 = vadd.f32 %v1419_v61, %v1371_v46  ;;  %v1652_v61 = vadd.f32 %v1651_v25, %v1607_v22  ;;  %v3625_v25 = vld [vmem:[#allocation8_spill] sm:$0xff] }
 0x31f   : > { %v1455_v9 = vmul.f32 0.2, %v1420_v2  ;;  %v1653_v11 = vadd.f32 %v1652_v61, %v1609_v39  ;;  %v3629_v61 = vld [vmem:[#allocation4_spill] sm:$0xff] }
 0x321   : > { %v1380_v34 = vpop.f32.mrf.mxu2  ;;  %v1487_v0 = vmax.f32 %v1420_v2, %v1455_v9  ;;  %v1654_v38 = vadd.f32 %v1653_v11, %v1611_v63  ;;  %v3624_v9 = vld [vmem:[#allocation22_spill] sm:$0xff] }
 0x322   : > { %v1381_v35 = vadd.f32 %v1380_v34, %v3595_v50  ;;  %v3617_v50 = vld [vmem:[#allocation17_spill] sm:$0xff] }
 0x323   : > { %v1615_v37 = vmul.f32 %v3617_v50, %v1487_v0  ;;  %v1753_v46 = vmul.f32 %v3618_v43, %v1487_v0  ;;  %v1655_v12 = vadd.f32 %v1654_v38, %v1613_v52  ;;  %v1891_v31 = vmul.f32 %v3619_v15, %v1487_v0 }
 0x324   : > { %v1421_v28 = vpop.f32.mrf.mxu3 }
 0x325   : > { %v1422_v1 = vadd.f32 %v1421_v28, %v1373_v59  ;;  %v1793_v59 = vadd.f32 %v1792_v45, %v1751_v49  ;;  %v1656_v32 = vadd.f32 %v1655_v12, %v1615_v37  ;;  %v3634_v37 = vld [vmem:[#allocation25_spill] sm:$0xff]  ;;  %v3635_v45 = vld [vmem:[#allocation14_spill] sm:$0xff] }
 0x327   : > { %v1457_v54 = vmul.f32 0.2, %v1422_v1  ;;  %v1794_v22 = vadd.f32 %v1793_v59, %v1753_v46 }
 0x329   : > { %v1489_v47 = vmax.f32 %v1422_v1, %v1457_v54  ;;  %v1382_v2 = vpop.f32.mrf.mxu2  ;;  %v3622_v1 = vld [vmem:[#allocation31_spill] sm:$0xff] }
 0x32a   : > { %v1383_v14 = vadd.f32 %v1382_v2, %v3625_v25 }
 0x32b   : > { %v1617_v23 = vmul.f32 %v3620_v19, %v1489_v47  ;;  %v1755_v16 = vmul.f32 %v3621_v55, %v1489_v47 }
 0x32c   : > { %v1424_v18 = vpop.f32.mrf.mxu3 }
 0x32d   : > { %v1425_v57 = vadd.f32 %v1424_v18, %v1376_v24  ;;  %v3616_v18 = vld [vmem:[#allocation29_spill] sm:$0xff]  ;;  %v1657_v53 = vadd.f32 %v1656_v32, %v1617_v23  ;;  %v1795_v26 = vadd.f32 %v1794_v22, %v1755_v16 }
 0x32e   : > { %v1889_v10 = vmul.f32 %v3616_v18, %v1485_v27  ;;  %v3627_v27 = vld [vmem:[#allocation18_spill] sm:$0xff] }
 0x32f   : > { %v1459_v28 = vmul.f32 0.2, %v1425_v57 }
 0x330   : > { %v1931_v4 = vadd.f32 %v1930_v3, %v1889_v10  ;;  %v3633_v10 = vld [vmem:[#allocation10_spill] sm:$0xff] }
 0x331   : > { %v1491_v20 = vmax.f32 %v1425_v57, %v1459_v28  ;;  %v3631_v28 = vld [vmem:[#allocation24_spill] sm:$0xff] }
 0x332   : > { %v1932_v57 = vadd.f32 %v1931_v4, %v1891_v31 }
 0x333   : > { %v1619_v8 = vmul.f32 %v3623_v17, %v1491_v20  ;;  %v1895_v39 = vmul.f32 %v3626_v7, %v1491_v20 }
 0x334   : > { %v1426_v51 = vpop.f32.mrf.mxu3 }
 0x335   : > { %v1427_v62 = vadd.f32 %v1426_v51, %v1378_v6  ;;  %v1893_v51 = vmul.f32 %v3622_v1, %v1489_v47  ;;  %v1757_v6 = vmul.f32 %v3624_v9, %v1491_v20  ;;  %v1658_v0 = vadd.f32 %v1657_v53, %v1619_v8 }
 0x337   : > { %v1461_v36 = vmul.f32 0.2, %v1427_v62 }
 0x339   : > { %v1493_v24 = vmax.f32 %v1427_v62, %v1461_v36  ;;  %v1933_v62 = vadd.f32 %v1932_v57, %v1893_v51 }
 0x33b   : > { %v1621_v42 = vmul.f32 %v3627_v27, %v1493_v24  ;;  %v1759_v58 = vmul.f32 %v3628_v44, %v1493_v24  ;;  %v1897_v48 = vmul.f32 %v3629_v61, %v1493_v24  ;;  %v1934_v41 = vadd.f32 %v1933_v62, %v1895_v39 }
 0x33c   : > { %v1429_v60 = vpop.f32.mrf.mxu3 }
 0x33d   : > { %v1430_v56 = vadd.f32 %v1429_v60, %v1381_v35  ;;  %v1796_v35 = vadd.f32 %v1795_v26, %v1757_v6  ;;  %v1659_v21 = vadd.f32 %v1658_v0, %v1621_v42  ;;  %v1935_v47 = vadd.f32 %v1934_v41, %v1897_v48  ;;  %v1954_v6 = vpop.permute.xlu2 %1953 }
 0x33f   : > { %v1463_v5 = vmul.f32 0.2, %v1430_v56  ;;  %v1797_v49 = vadd.f32 %v1796_v35, %v1759_v58 }
 0x341   : > { %v1495_v34 = vmax.f32 %v1430_v56, %v1463_v5 }
 0x343   : > { %v1623_v13 = vmul.f32 %v3630_v40, %v1495_v34  ;;  %v1761_v11 = vmul.f32 %v3631_v28, %v1495_v34  ;;  %v1899_v52 = vmul.f32 %v3632_v30, %v1495_v34 }
 0x344   : > { %v1431_v54 = vpop.f32.mrf.mxu3 }
 0x345   : > { %v1432_v63 = vadd.f32 %v1431_v54, %v1383_v14  ;;  %v1660_v60 = vadd.f32 %v1659_v21, %v1623_v13  ;;  %v1798_v38 = vadd.f32 %v1797_v49, %v1761_v11  ;;  %v1936_v18 = vadd.f32 %v1935_v47, %v1899_v52 }
 0x346   : > { %v1956_v14 = vadd.f32 %v1954_v6, %v3380_v29 }
 0x347   : > { %v1465_v33 = vmul.f32 0.2, %v1432_v63 }
 0x349   : > { %v1497_v36 = vmax.f32 %v1432_v63, %v1465_v33 }
 0x34b   : > { %v1625_v50 = vmul.f32 %v3633_v10, %v1497_v36  ;;  %v1763_v56 = vmul.f32 %v3634_v37, %v1497_v36  ;;  %v1901_v43 = vmul.f32 %v3635_v45, %v1497_v36 }
 0x34d   : > { %v1661_v46 = vadd.f32 %v1660_v60, %v1625_v50  ;;  %v1799_v20 = vadd.f32 %v1798_v38, %v1763_v56  ;;  %v1937_v3 = vadd.f32 %v1936_v18, %v1901_v43 }
 0x34f   : > { %v1662_v12 = vrot.slane %v1661_v46, 4  ;;  %v1800_v15 = vrot.slane %v1799_v20, 4  ;;  %v1938_v31 = vrot.slane %v1937_v3, 4 }
 0x351   : > { %v1663_v5 = vadd.f32 %v1662_v12, %v1661_v46  ;;  %v1801_v2 = vadd.f32 %v1800_v15, %v1799_v20  ;;  %v1939_v59 = vadd.f32 %v1938_v31, %v1937_v3 }
 0x353   : > { %v1664_v19 = vrot.slane %v1663_v5, 2  ;;  %v1802_v23 = vrot.slane %v1801_v2, 2  ;;  %v1940_v55 = vrot.slane %v1939_v59, 2 }
 0x355   : > { %v1665_v16 = vadd.f32 %v1664_v19, %v1663_v5  ;;  %v1803_v24 = vadd.f32 %v1802_v23, %v1801_v2  ;;  %v1941_v4 = vadd.f32 %v1940_v55, %v1939_v59 }
 0x357   : > { %v1666_v32 = vrot.slane %v1665_v16, 1  ;;  %v1804_v1 = vrot.slane %v1803_v24, 1  ;;  %v1942_v51 = vrot.slane %v1941_v4, 1 }
 0x359   : > { %v1667_v22 = vadd.f32 %v1666_v32, %v1665_v16  ;;  %v1805_v17 = vadd.f32 %v1804_v1, %v1803_v24  ;;  %v1943_v8 = vadd.f32 %v1942_v51, %v1941_v4 }
 0x35b   : > { %v1946_v9 = vsel %vm1944_vm1, %v1667_v22, %v1805_v17 }
 0x35c   : > { %v1949_v34 = vsel %vm1947_vm2, %v1946_v9, %v1943_v8 }
 0x35d   : > { %v1957_v25 = vadd.f32 %v1954_v6, %v1949_v34 }
 0x35f   : > { %v1960_v57 = vrot.slane %v1957_v25, 4 }
 0x361   : > { %v1962_v7 = vsel %vm1961_vm3, %v1956_v14, %v1960_v57 }
 0x362   : > { %1964 = vst [vmem:[%s316_s10] sm:$0x77] %v1962_v7 }
 0x363 PF: > { %s17_s26 = sadd.s32 1, %s2316_s26   ;;  %s3636_s24 = smov %s2312_s25 }
 0x364   : > { %p14_p5 = scmp.ge.s32.totalorder %s17_s26, 4   ;;  %s3637_s25 = smov %s3639_s27 }
 0x366   :  { %16 = sbr.rel (!%p14_p5) target bundleno = 2 (0x2), region = 78 }

</bundles_post_ra>
